<compile_context>
chip_gen: v6e
topology: v6e:2x2x1
jax: 0.10.0
libtpu: 0.0.40
codegen_flags: <defaults>
</compile_context>

<pallas_src>
import math

import jax
import jax.numpy as jnp
from jax.experimental import pallas as pl
from jax.experimental.pallas import tpu as pltpu

N2 = 128
IN_DIM = 2 * N2           # 256
HID = 20
HEAD_HID = 3 * HID        # 60 (three fused heads: u | v | p)
LAYERS_TRUNK = [IN_DIM, HID, HID, HID]
LAYERS_HEAD = [HID, HID, HID, 1]


# --------------------------------------------------------------------------
# Kernel: whole forward pass for one batch tile, feature-major activations.
#   x block   : (IN_DIM, tile_b)   (batch on the 128-lane axis, plain NN matmuls)
#   acts      : (20|60, tile_b)
#   out block : (3, tile_b)        (lane-dense store)
# 5 matmuls total: trunk L0, trunk L1, head L0 (with trunk L2 folded in),
# head L1, head L2.
# --------------------------------------------------------------------------
def dnn_kernel(x_ref,
               w0_ref, b0_ref, w1_ref, b1_ref,             # trunk (L2 folded away)
               wh0_ref, bh0_ref, wh1_ref, bh1_ref, wh2_ref, bh2_ref,  # fused heads
               out_ref):
    f32 = jnp.float32
    cdt = w0_ref.dtype                  # MXU input dtype (f32 or bf16)
    x = x_ref[...]                      # (IN_DIM, tile_b), already compute dtype

    # trunk layer 0 / 1 (tanh)
    h = jnp.tanh(jnp.dot(w0_ref[...], x, preferred_element_type=f32) + b0_ref[...])
    h = jnp.tanh(jnp.dot(w1_ref[...], h.astype(cdt),
                         preferred_element_type=f32) + b1_ref[...])

    # fused heads (trunk layer 2 already folded into wh0/bh0 on the host)
    z = jnp.tanh(jnp.dot(wh0_ref[...], h.astype(cdt),
                         preferred_element_type=f32) + bh0_ref[...])
    z = jnp.tanh(jnp.dot(wh1_ref[...], z.astype(cdt),
                         preferred_element_type=f32) + bh1_ref[...])
    y = jnp.dot(wh2_ref[...], z.astype(cdt),
                preferred_element_type=f32) + bh2_ref[...]           # (3, tile_b)

    out_ref[...] = y.astype(out_ref.dtype)


# --------------------------------------------------------------------------
# Parameter init (deterministic, mirrors torch: xavier_uniform_ weights,
# default U(-1/sqrt(fan_in), 1/sqrt(fan_in)) biases).  Weights are (out, in)
# like torch.nn.Linear.weight.
# --------------------------------------------------------------------------
def init_mlp(key, layer_sizes):
    params = []
    for i in range(len(layer_sizes) - 1):
        fan_in, fan_out = layer_sizes[i], layer_sizes[i + 1]
        key, kw, kb = jax.random.split(key, 3)
        bound_w = math.sqrt(6.0 / (fan_in + fan_out))
        w = jax.random.uniform(kw, (fan_out, fan_in), jnp.float32, -bound_w, bound_w)
        bound_b = 1.0 / math.sqrt(fan_in)
        b = jax.random.uniform(kb, (fan_out,), jnp.float32, -bound_b, bound_b)
        params.append((w, b))
    return key, params


def _block_diag3(a, b, c):
    ra, ca = a.shape
    rb, cb = b.shape
    rc, cc = c.shape
    out = jnp.zeros((ra + rb + rc, ca + cb + cc), a.dtype)
    out = out.at[:ra, :ca].set(a)
    out = out.at[ra:ra + rb, ca:ca + cb].set(b)
    out = out.at[ra + rb:, ca + cb:].set(c)
    return out


def pack_params(trunk, head_u, head_v, head_p):
    """Build the 10 kernel params: trunk L0/L1 as-is, heads fused block-diagonally,
    and the activation-free trunk L2 folded into head layer 0 (exact algebra)."""
    (w0, b0), (w1, b1), (w2, b2) = trunk
    col = lambda b: b.reshape(-1, 1)

    # head layer 0: stack the three (20,20) weights along the output axis -> (60,20)
    wh0 = jnp.concatenate([head_u[0][0], head_v[0][0], head_p[0][0]], axis=0)
    bh0 = jnp.concatenate([head_u[0][1], head_v[0][1], head_p[0][1]], axis=0)
    # fold trunk layer 2 (linear, no activation) into head layer 0
    wh0f = wh0 @ w2                    # (60, 20)
    bh0f = wh0 @ b2 + bh0              # (60,)
    # head layer 1: block-diagonal -> (60,60)  (no cross-talk between heads)
    wh1 = _block_diag3(head_u[1][0], head_v[1][0], head_p[1][0])
    bh1 = jnp.concatenate([head_u[1][1], head_v[1][1], head_p[1][1]], axis=0)
    # head layer 2: block-diagonal of the (1,20) rows -> (3,60)
    wh2 = _block_diag3(head_u[2][0], head_v[2][0], head_p[2][0])
    bh2 = jnp.concatenate([head_u[2][1], head_v[2][1], head_p[2][1]], axis=0)

    return [w0, col(b0), w1, col(b1),
            wh0f, col(bh0f), wh1, col(bh1), wh2, col(bh2)]


# --------------------------------------------------------------------------
# Tile / VMEM helpers.
# --------------------------------------------------------------------------
def _pick_tile(B, tile_b):
    """Largest 128-multiple <= tile_b, capped near ceil(B/2) so the grid keeps
    >= 2 steps (v7x megacore) and the partial last block wastes < ~half a tile."""
    tile_b = max(128, (int(tile_b) // 128) * 128)
    half_b = pl.cdiv(pl.cdiv(B, 2), 128) * 128
    return max(128, min(tile_b, half_b))


def _vmem_limit_bytes(tile, x_itemsize, x_bufs):
    x_bytes = x_bufs * IN_DIM * tile * x_itemsize      # streamed input tiles
    out_bytes = 2 * 8 * tile * 4                       # (3,tile) pads to 8 sublanes, x2 buffers
    inter_bytes = 256 * tile * 4                       # f32 activations (20->24, 60->64) + temps
    weight_bytes = 2 << 20                             # all weights/biases incl. padding, x2 buffers
    slack = 4 << 20                                    # compiler internal scratch headroom
    limit = x_bytes + out_bytes + inter_bytes + weight_bytes + slack
    return int(min(max(limit, 16 << 20), 48 << 20))    # <= 48 MiB: safe on v7x (64 MiB physical)


# --------------------------------------------------------------------------
# Wrapper: pallas_call with large batch tiles, no host-side padding.
#   tile_b    : sweep 2048-4096 (adaptively capped for small batches).
#   use_bf16  : bf16 MXU inputs, f32 accumulation (reduced precision, faster).
#   x_buffer_count: set 3 on v6e if the x DMA becomes exposed at large tiles.
# --------------------------------------------------------------------------
def dnn_forward(x, packed_params, tile_b=4096, use_bf16=False, x_buffer_count=2):
    B, F = x.shape
    assert F == IN_DIM
    cdt = jnp.bfloat16 if use_bf16 else jnp.float32

    # Feature-major x (IN_DIM, B): one wrapper-side transpose; every in-kernel
    # matmul is then a plain NN MXU op (no transposes inside the kernel).
    xt = jnp.asarray(x, cdt).T

    # Weights feed the MXU (cast to compute dtype); biases stay f32.
    params = [p.astype(cdt) if i % 2 == 0 else p.astype(jnp.float32)
              for i, p in enumerate(packed_params)]

    tile = _pick_tile(B, tile_b)
    grid = (pl.cdiv(B, tile),)

    x_spec = (pl.BlockSpec((IN_DIM, tile), lambda i: (0, i))
              if x_buffer_count == 2 else
              pl.BlockSpec((IN_DIM, tile), lambda i: (0, i),
                           pipeline_mode=pl.Buffered(x_buffer_count)))
    in_specs = [x_spec] + [pl.BlockSpec(p.shape, lambda i: (0, 0)) for p in params]
    out_spec = pl.BlockSpec((3, tile), lambda i: (0, i))            # lane-dense store

    out_t = pl.pallas_call(
        dnn_kernel,
        out_shape=jax.ShapeDtypeStruct((3, B), jnp.float32),
        grid_spec=pltpu.PrefetchScalarGridSpec(
            num_scalar_prefetch=0,
            grid=grid,
            in_specs=in_specs,
            out_specs=out_spec,
        ),
        compiler_params=pltpu.CompilerParams(
            dimension_semantics=("parallel",),
            vmem_limit_bytes=_vmem_limit_bytes(tile, xt.dtype.itemsize,
                                               max(2, x_buffer_count)),
        ),
    )(xt, *params)

    # (3, B) -> (B, 3); matches torch.cat([u, v, p], dim=1)
    return out_t.T


# --------------------------------------------------------------------------
# Pure-JAX reference (unfused, batch-major, f32) for correctness check only.
# --------------------------------------------------------------------------
def ref_forward(x, trunk, head_u, head_v, head_p):
    def mlp(h, layers_):
        for i, (w, b) in enumerate(layers_):
            h = h @ w.T + b
            if i < len(layers_) - 1:
                h = jnp.tanh(h)
        return h

    h = mlp(x, trunk)
    return jnp.concatenate([mlp(h, head_u), mlp(h, head_v), mlp(h, head_p)], axis=1)


if __name__ == "__main__":
    key = jax.random.PRNGKey(0)

    key, trunk_params = init_mlp(key, LAYERS_TRUNK)
    key, u_params = init_mlp(key, LAYERS_HEAD)
    key, v_params = init_mlp(key, LAYERS_HEAD)
    key, p_params = init_mlp(key, LAYERS_HEAD)
    packed = pack_params(trunk_params, u_params, v_params, p_params)

    key, kx = jax.random.split(key)
    B = 777                              # not a tile multiple: exercises partial-last-block path; grid = 2
    x = jax.random.normal(kx, (B, IN_DIM), jnp.float32)

    ref = ref_forward(x, trunk_params, u_params, v_params, p_params)

    # f32 path (default): closest TPU match to the (f64) PyTorch module.
    out = jax.block_until_ready(dnn_forward(x, packed))
    assert out.shape == (B, 3)
    assert jnp.allclose(out, ref, atol=1e-4, rtol=1e-4), "f32 mismatch vs reference"

    # bf16-MXU fast path: ~3x MXU throughput, half the x HBM traffic.
    # Loose tolerance — reduced-precision path (see f64 TODO above).
    out_bf16 = jax.block_until_ready(dnn_forward(x, packed, use_bf16=True))
    assert out_bf16.shape == (B, 3)
    assert jnp.allclose(out_bf16, ref, atol=1e-1, rtol=1e-2), "bf16 mismatch vs reference"

    print("KERNEL_OK")
</pallas_src>

<mosaic_0001>
module attributes {stable_mosaic.version = 11 : i64} {
  func.func @dnn_kernel(%arg0: i32, %arg1: memref<256x512xf32, #tpu.memory_space<vmem>>, %arg2: memref<20x256xf32, #tpu.memory_space<vmem>>, %arg3: memref<20x1xf32, #tpu.memory_space<vmem>>, %arg4: memref<20x20xf32, #tpu.memory_space<vmem>>, %arg5: memref<20x1xf32, #tpu.memory_space<vmem>>, %arg6: memref<60x20xf32, #tpu.memory_space<vmem>>, %arg7: memref<60x1xf32, #tpu.memory_space<vmem>>, %arg8: memref<60x60xf32, #tpu.memory_space<vmem>>, %arg9: memref<60x1xf32, #tpu.memory_space<vmem>>, %arg10: memref<3x60xf32, #tpu.memory_space<vmem>>, %arg11: memref<3x1xf32, #tpu.memory_space<vmem>>, %arg12: memref<3x512xf32, #tpu.memory_space<vmem>>) attributes {dimension_semantics = [#tpu.dimension_semantics<parallel>], iteration_bounds = array<i64: 2>, scalar_prefetch = 0 : i64, scratch_operands = 0 : i64, tpu.core_type = #tpu.core_type<tc>, window_params = [{transform_indices = @transform_0, window_bounds = array<i64: 256, 512>}, {pipeline_mode = #tpu.pipeline_mode<synchronous>, transform_indices = @transform_1, window_bounds = array<i64: 20, 256>}, {pipeline_mode = #tpu.pipeline_mode<synchronous>, transform_indices = @transform_2, window_bounds = array<i64: 20, 1>}, {pipeline_mode = #tpu.pipeline_mode<synchronous>, transform_indices = @transform_3, window_bounds = array<i64: 20, 20>}, {pipeline_mode = #tpu.pipeline_mode<synchronous>, transform_indices = @transform_4, window_bounds = array<i64: 20, 1>}, {pipeline_mode = #tpu.pipeline_mode<synchronous>, transform_indices = @transform_5, window_bounds = array<i64: 60, 20>}, {pipeline_mode = #tpu.pipeline_mode<synchronous>, transform_indices = @transform_6, window_bounds = array<i64: 60, 1>}, {pipeline_mode = #tpu.pipeline_mode<synchronous>, transform_indices = @transform_7, window_bounds = array<i64: 60, 60>}, {pipeline_mode = #tpu.pipeline_mode<synchronous>, transform_indices = @transform_8, window_bounds = array<i64: 60, 1>}, {pipeline_mode = #tpu.pipeline_mode<synchronous>, transform_indices = @transform_9, window_bounds = array<i64: 3, 60>}, {pipeline_mode = #tpu.pipeline_mode<synchronous>, transform_indices = @transform_10, window_bounds = array<i64: 3, 1>}, {transform_indices = @transform_11, window_bounds = array<i64: 3, 512>}]} {
    %c0 = arith.constant 0 : index
    %c0_0 = arith.constant 0 : index
    %0 = vector.load %arg1[%c0, %c0_0] : memref<256x512xf32, #tpu.memory_space<vmem>>, vector<256x512xf32>
    %c0_1 = arith.constant 0 : index
    %c0_2 = arith.constant 0 : index
    %1 = vector.load %arg2[%c0_1, %c0_2] : memref<20x256xf32, #tpu.memory_space<vmem>>, vector<20x256xf32>
    %cst = arith.constant dense<0.000000e+00> : vector<20x512xf32>
    %2 = tpu.matmul %1, %0, %cst {dimension_numbers = #tpu.dot_dimension_numbers<[1], [0], [0], [1], [0, 0, 1, 1], [], []>} : vector<20x256xf32>, vector<256x512xf32>, vector<20x512xf32> -> vector<20x512xf32>
    %c0_3 = arith.constant 0 : index
    %c0_4 = arith.constant 0 : index
    %3 = vector.load %arg3[%c0_3, %c0_4] : memref<20x1xf32, #tpu.memory_space<vmem>>, vector<20x1xf32>
    %4 = vector.broadcast %3 : vector<20x1xf32> to vector<20x512xf32>
    %5 = arith.addf %2, %4 : vector<20x512xf32>
    %6 = math.tanh %5 : vector<20x512xf32>
    %c0_5 = arith.constant 0 : index
    %c0_6 = arith.constant 0 : index
    %7 = vector.load %arg4[%c0_5, %c0_6] : memref<20x20xf32, #tpu.memory_space<vmem>>, vector<20x20xf32>
    %cst_7 = arith.constant dense<0.000000e+00> : vector<20x512xf32>
    %8 = tpu.matmul %7, %6, %cst_7 {dimension_numbers = #tpu.dot_dimension_numbers<[1], [0], [0], [1], [0, 0, 1, 1], [], []>} : vector<20x20xf32>, vector<20x512xf32>, vector<20x512xf32> -> vector<20x512xf32>
    %c0_8 = arith.constant 0 : index
    %c0_9 = arith.constant 0 : index
    %9 = vector.load %arg5[%c0_8, %c0_9] : memref<20x1xf32, #tpu.memory_space<vmem>>, vector<20x1xf32>
    %10 = vector.broadcast %9 : vector<20x1xf32> to vector<20x512xf32>
    %11 = arith.addf %8, %10 : vector<20x512xf32>
    %12 = math.tanh %11 : vector<20x512xf32>
    %c0_10 = arith.constant 0 : index
    %c0_11 = arith.constant 0 : index
    %13 = vector.load %arg6[%c0_10, %c0_11] : memref<60x20xf32, #tpu.memory_space<vmem>>, vector<60x20xf32>
    %cst_12 = arith.constant dense<0.000000e+00> : vector<60x512xf32>
    %14 = tpu.matmul %13, %12, %cst_12 {dimension_numbers = #tpu.dot_dimension_numbers<[1], [0], [0], [1], [0, 0, 1, 1], [], []>} : vector<60x20xf32>, vector<20x512xf32>, vector<60x512xf32> -> vector<60x512xf32>
    %c0_13 = arith.constant 0 : index
    %c0_14 = arith.constant 0 : index
    %15 = vector.load %arg7[%c0_13, %c0_14] : memref<60x1xf32, #tpu.memory_space<vmem>>, vector<60x1xf32>
    %16 = vector.broadcast %15 : vector<60x1xf32> to vector<60x512xf32>
    %17 = arith.addf %14, %16 : vector<60x512xf32>
    %18 = math.tanh %17 : vector<60x512xf32>
    %c0_15 = arith.constant 0 : index
    %c0_16 = arith.constant 0 : index
    %19 = vector.load %arg8[%c0_15, %c0_16] : memref<60x60xf32, #tpu.memory_space<vmem>>, vector<60x60xf32>
    %cst_17 = arith.constant dense<0.000000e+00> : vector<60x512xf32>
    %20 = tpu.matmul %19, %18, %cst_17 {dimension_numbers = #tpu.dot_dimension_numbers<[1], [0], [0], [1], [0, 0, 1, 1], [], []>} : vector<60x60xf32>, vector<60x512xf32>, vector<60x512xf32> -> vector<60x512xf32>
    %c0_18 = arith.constant 0 : index
    %c0_19 = arith.constant 0 : index
    %21 = vector.load %arg9[%c0_18, %c0_19] : memref<60x1xf32, #tpu.memory_space<vmem>>, vector<60x1xf32>
    %22 = vector.broadcast %21 : vector<60x1xf32> to vector<60x512xf32>
    %23 = arith.addf %20, %22 : vector<60x512xf32>
    %24 = math.tanh %23 : vector<60x512xf32>
    %c0_20 = arith.constant 0 : index
    %c0_21 = arith.constant 0 : index
    %25 = vector.load %arg10[%c0_20, %c0_21] : memref<3x60xf32, #tpu.memory_space<vmem>>, vector<3x60xf32>
    %cst_22 = arith.constant dense<0.000000e+00> : vector<3x512xf32>
    %26 = tpu.matmul %25, %24, %cst_22 {dimension_numbers = #tpu.dot_dimension_numbers<[1], [0], [0], [1], [0, 0, 1, 1], [], []>} : vector<3x60xf32>, vector<60x512xf32>, vector<3x512xf32> -> vector<3x512xf32>
    %c0_23 = arith.constant 0 : index
    %c0_24 = arith.constant 0 : index
    %27 = vector.load %arg11[%c0_23, %c0_24] : memref<3x1xf32, #tpu.memory_space<vmem>>, vector<3x1xf32>
    %28 = vector.broadcast %27 : vector<3x1xf32> to vector<3x512xf32>
    %29 = arith.addf %26, %28 : vector<3x512xf32>
    %c0_25 = arith.constant 0 : index
    %c0_26 = arith.constant 0 : index
    %30 = vector.load %arg12[%c0_25, %c0_26] : memref<3x512xf32, #tpu.memory_space<vmem>>, vector<3x512xf32>
    tpu.vector_store %arg12[%c0_25, %c0_26], %29 {strides = array<i32>} : memref<3x512xf32, #tpu.memory_space<vmem>>, vector<3x512xf32>,
    return
  }
  func.func @transform_0(%arg0: i32) -> (i32, i32) {
    %c0_i32 = arith.constant 0 : i32
    %c0_i32_0 = arith.constant 0 : i32
    return %c0_i32, %arg0 : i32, i32
  }
  func.func @transform_1(%arg0: i32) -> (i32, i32) {
    %c0_i32 = arith.constant 0 : i32
    %c0_i32_0 = arith.constant 0 : i32
    %c0_i32_1 = arith.constant 0 : i32
    return %c0_i32, %c0_i32_0 : i32, i32
  }
  func.func @transform_2(%arg0: i32) -> (i32, i32) {
    %c0_i32 = arith.constant 0 : i32
    %c0_i32_0 = arith.constant 0 : i32
    %c0_i32_1 = arith.constant 0 : i32
    return %c0_i32, %c0_i32_0 : i32, i32
  }
  func.func @transform_3(%arg0: i32) -> (i32, i32) {
    %c0_i32 = arith.constant 0 : i32
    %c0_i32_0 = arith.constant 0 : i32
    %c0_i32_1 = arith.constant 0 : i32
    return %c0_i32, %c0_i32_0 : i32, i32
  }
  func.func @transform_4(%arg0: i32) -> (i32, i32) {
    %c0_i32 = arith.constant 0 : i32
    %c0_i32_0 = arith.constant 0 : i32
    %c0_i32_1 = arith.constant 0 : i32
    return %c0_i32, %c0_i32_0 : i32, i32
  }
  func.func @transform_5(%arg0: i32) -> (i32, i32) {
    %c0_i32 = arith.constant 0 : i32
    %c0_i32_0 = arith.constant 0 : i32
    %c0_i32_1 = arith.constant 0 : i32
    return %c0_i32, %c0_i32_0 : i32, i32
  }
  func.func @transform_6(%arg0: i32) -> (i32, i32) {
    %c0_i32 = arith.constant 0 : i32
    %c0_i32_0 = arith.constant 0 : i32
    %c0_i32_1 = arith.constant 0 : i32
    return %c0_i32, %c0_i32_0 : i32, i32
  }
  func.func @transform_7(%arg0: i32) -> (i32, i32) {
    %c0_i32 = arith.constant 0 : i32
    %c0_i32_0 = arith.constant 0 : i32
    %c0_i32_1 = arith.constant 0 : i32
    return %c0_i32, %c0_i32_0 : i32, i32
  }
  func.func @transform_8(%arg0: i32) -> (i32, i32) {
    %c0_i32 = arith.constant 0 : i32
    %c0_i32_0 = arith.constant 0 : i32
    %c0_i32_1 = arith.constant 0 : i32
    return %c0_i32, %c0_i32_0 : i32, i32
  }
  func.func @transform_9(%arg0: i32) -> (i32, i32) {
    %c0_i32 = arith.constant 0 : i32
    %c0_i32_0 = arith.constant 0 : i32
    %c0_i32_1 = arith.constant 0 : i32
    return %c0_i32, %c0_i32_0 : i32, i32
  }
  func.func @transform_10(%arg0: i32) -> (i32, i32) {
    %c0_i32 = arith.constant 0 : i32
    %c0_i32_0 = arith.constant 0 : i32
    %c0_i32_1 = arith.constant 0 : i32
    return %c0_i32, %c0_i32_0 : i32, i32
  }
  func.func @transform_11(%arg0: i32) -> (i32, i32) {
    %c0_i32 = arith.constant 0 : i32
    %c0_i32_0 = arith.constant 0 : i32
    return %c0_i32, %arg0 : i32, i32
  }
}

</mosaic_0001>

<bundles_post_ra>
// kernel: tpu_custom_call.1
= control target key start
LH: loop header
LB: loop body
LE: loop exit
PB: predicated region body
PF: predicated region fallthrough
CT: control target
= control target key end

     0   :  { %s4894_s0 = inlined_call_operand.vmem [shape: f32[256,777], index: 0, kind: input, shape index: {}]   ;;  %s4895_s1 = inlined_call_operand.vmem [shape: f32[20,256], index: 1, kind: input, shape index: {}]   ;;  %s4896_s2 = inlined_call_operand.vmem [shape: f32[20,1], index: 2, kind: input, shape index: {}]   ;;  %s4897_s3 = inlined_call_operand.vmem [shape: f32[20,20], index: 3, kind: input, shape index: {}]   ;;  %s4898_s4 = inlined_call_operand.vmem [shape: f32[20,1], index: 4, kind: input, shape index: {}]   ;;  %s4899_s5 = inlined_call_operand.vmem [shape: f32[60,20], index: 5, kind: input, shape index: {}]   ;;  %s4900_s6 = inlined_call_operand.vmem [shape: f32[60,1], index: 6, kind: input, shape index: {}]   ;;  %s4901_s7 = inlined_call_operand.vmem [shape: f32[60,60], index: 7, kind: input, shape index: {}]   ;;  %s4902_s8 = inlined_call_operand.vmem [shape: f32[60,1], index: 8, kind: input, shape index: {}]   ;;  %s4903_s9 = inlined_call_operand.vmem [shape: f32[3,60], index: 9, kind: input, shape index: {}]   ;;  %s4904_s10 = inlined_call_operand.vmem [shape: f32[3,1], index: 10, kind: input, shape index: {}]   ;;  %s4905_s11 = inlined_call_operand.hbm [shape: f32[3,777], index: 11, kind: output, shape index: {}]  }
   0x1   :  { %4916 = sst [smem:[#allocation13_spill]] %s4894_s0 }
   0x2   :  { %4917 = sst [smem:[#allocation14_spill]] %s4905_s11 }
   0x3   :  { %16 = vsyncpa [#allocation4], 0 }
   0x4   :  { %18 = vsyncpa [#allocation4 + $0x1], 0  ;;  %s3358_s17 = smov 0   ;;  %s3360_s18 = smov 0  }
   0x5   :  { %s3362_s19 = smov 0   ;;  %s3364_s20 = smov 0  }
   0x6 LB: > { %4918 = sst [smem:[#allocation6_spill]] %s3215_s17  ;;  %s3379_s21 = sadd.s32 4294967295, %s3227_s20   ;;  %s3227_s20 = sphi %s3364_s20, %s4954_s20   ;;  %s3223_s19 = sphi %s3362_s19, %s4956_s19   ;;  %s3219_s18 = sphi %s3360_s18, %s4958_s18   ;;  %s3215_s17 = sphi %s3358_s17, %s4957_s17  }
   0x7   : > { %4919 = sst [smem:[#allocation7_spill]] %s3223_s19  ;;  %s2649_s22 = sadd.s32 4294967294, %s3227_s20  }
   0x8   : > { %4920 = sst [smem:[#allocation8_spill]] %s3379_s21  ;;  %s3383_s23 = sadd.s32 1, %s3227_s20  }
   0x9   : > { %4921 = sst [smem:[#allocation9_spill]] %s3383_s23  ;;  %s31_s24 = sadd.s32 1, %s3223_s19 }
   0xa   : > { %s28_s25 = ssub.s32 %s3227_s20, %s3383_s23  ;;  %p38_p0 = scmp.ne.s32.totalorder %s3223_s19, %s3219_s18 }
   0xb   : > { %p29_p1 = scmp.eq.s32.totalorder %s28_s25, 0  ;;  %p39_p2 = scmp.eq.s32.totalorder %s3227_s20, 0 }
   0xc   : > { %p278_p3 = scmp.eq.s32.totalorder %s3379_s21, 1  ;;  %p283_p4 = scmp.ne.s32.totalorder %s3219_s18, %s3215_s17 }
   0xd   : > { %s3395_s26 = scalar_select %p29_p1, %s3223_s19, %s31_s24  }
   0xe   : > { %p40_p5 = por %p39_p2, %p38_p0  ;;  %p3397_p6 = por %p278_p3, %p38_p0 }
   0xf   : > { %4922 = sst [smem:[#allocation10_spill]] %s3395_s26  ;;  %p284_p7 = scmp.eq.s32.totalorder %s2649_s22, 1 }
  0x10   : > { %s4923_s27 = scalar_select %p3397_p6, 1, 0 }
  0x11   : > { %p3401_p8 = por %p284_p7, %p283_p4  ;;  %p2651_p9 = scmp.ge.s32.totalorder %s3227_s20, 2 }
  0x12   : > { %4924 = sst [smem:[#allocation11_spill]] %s4923_s27 }
  0x13   : > { %s4925_s28 = scalar_select %p3401_p8, 1, 0 }
  0x14   : > { %330 = sbr.rel (%p2651_p9) target bundleno = 256 (0x100), region = 56 }
  0x15   : > { %4926 = sst [smem:[#allocation12_spill]] %s4925_s28 }
  0x19   : > { %333 = sbr.rel (!%p40_p5) target bundleno = 256 (0x100), region = 60  ;;  %s335_s29 = sand.u32 (%p40_p5), 1, %s3223_s19  }
  0x1a   : > { %s2653_s30 = sshll.u32 (%p40_p5), %s3227_s20, 2  ;;  %s2652_s12 = sshll.u32 (%p40_p5), %s335_s29, 10 }
  0x1b   : > { %s339_s13 = ssub.s32 (%p40_p5), 7, %s2653_s30  ;;  %s2749_s14 = sshll.u32 (%p40_p5), %s3227_s20, 5 }
  0x1c   : > { %p340_p10 = scmp.lt.s32.totalorder (%p40_p5), %s339_s13, 4  ;;  %s4927_s0 = sld [smem:[#allocation13_spill]] (%p40_p5) }
  0x1d   : > { %s3418_s26 = scalar_lea.vmem (%p40_p5), [#allocation2], %s2652_s12  }
  0x1e   : > { %s4960_s13 = smov (!%p340_p10, %s339_s13), 4 }
  0x1f   : > { %s2654_s24 = sshll.u32 %s4960_s13, 12  ;;  %s3416_s25 = sshll.u32 %s4960_s13, 3 }
  0x20   : > { %p2658_p11 = scmp.eq.s32.totalorder %s2654_s24, 0 }
  0x21   : > { %p350_p12 = scmp.lt.u32.totalorder (!%p2658_p11), %s3416_s25, 8 }
  0x22   : > { %s3414_s22 = scalar_lea.vmem %s4927_s0, %s2749_s14   ;;  %349 = sbr.rel (%p2658_p11) target bundleno = 256 (0x100), region = 64 }
  0x27   : > { %353 = sbr.rel (%p350_p12) target bundleno = 217 (0xd9), region = 68  ;;  %s3422_s29 = sand.u32 (!%p350_p12), 7, %s3416_s25  }
  0x28   : > { %p432_p13 = scmp.eq.s32.totalorder (!%p350_p12), %s3422_s29, 0  ;;  %p2659_p0 = scmp.ne.s32.totalorder (!%p350_p12), %s3422_s29, 0 }
  0x2c   : > { %435 = sbr.rel (%p2659_p0) target bundleno = 114 (0x72), region = 83  ;;  %s4906_s30 = sshrl.u32 (!%p2659_p0), %s3416_s25, 3 }
  0x2d   : > { %s3429_s13 = sshrl.u32 (!%p2659_p0), %s4906_s30, 1 }
  0x2e   : > { %p2660_p1 = scmp.le.s32.totalorder (!%p2659_p0), %s3429_s13, 0 }
  0x31   : > { %2577 = sbr.rel (%p2660_p1) target bundleno = 87 (0x57), region = 182  ;;  %s4928_s12 = smov (!%p2660_p1), %s3418_s26 }
  0x32   : > { %s4929_s14 = smov (!%p2660_p1), %s3414_s22  ;;  %s3438_s15 = smov (!%p2660_p1), 0  }
  0x33   : > { %s3440_s16 = smov (!%p2660_p1), 0  }
  0x36 LB: >> { %v449_v0 = vld [vmem:[%s3235_s14] sm:$0xff]  ;;  %v451_v1 = vld [vmem:[%s3235_s14 + $0x8] sm:$0xff]  ;;  %v453_v2 = vld [vmem:[%s3235_s14 + $0x38] sm:$0xff]  ;;  %s577_s24 = sadd.s32 1, %s3239_s15  ;;  %s443_s16 = sadd.s32 1, %s3243_s16   ;;  %s3243_s16 = sphi %s3440_s16, %s443_s16   ;;  %s3239_s15 = sphi %s3438_s15, %s4932_s15   ;;  %s3235_s14 = sphi %s4929_s14, %s4931_s14   ;;  %s3231_s12 = sphi %s4928_s12, %s4930_s12  }
  0x37   : >> { %450 = vst [vmem:[%s3231_s12] sm:$0xff] %v449_v0  ;;  %452 = vst [vmem:[%s3231_s12 + $0x8] sm:$0xff] %v451_v1  ;;  %v455_v3 = vld [vmem:[%s3235_s14 + $0x40] sm:$0xff]  ;;  %v457_v4 = vld [vmem:[%s3235_s14 + $0x70] sm:$0xff]  ;;  %p578_p2 = scmp.ge.s32.totalorder %s577_s24, %s3429_s13  ;;  %p442_p3 = scmp.ge.s32.totalorder %s443_s16, %s3429_s13 }
  0x38   : >> { %454 = vst [vmem:[%s3231_s12 + $0x20] sm:$0xff] %v453_v2  ;;  %v459_v5 = vld [vmem:[%s3235_s14 + $0x78] sm:$0xff]  ;;  %456 = vst [vmem:[%s3231_s12 + $0x28] sm:$0xff] %v455_v3  ;;  %v461_v6 = vld [vmem:[%s3235_s14 + $0xa8] sm:$0xff] }
  0x39   : >> { %458 = vst [vmem:[%s3231_s12 + $0x40] sm:$0xff] %v457_v4  ;;  %460 = vst [vmem:[%s3231_s12 + $0x48] sm:$0xff] %v459_v5  ;;  %v463_v7 = vld [vmem:[%s3235_s14 + $0xb0] sm:$0xff]  ;;  %v465_v8 = vld [vmem:[%s3235_s14 + $0xe0] sm:$0xff]  ;;  %s4962_s24 = smov (%p578_p2, %s577_s24), 0 }
  0x3a   : >> { %462 = vst [vmem:[%s3231_s12 + $0x60] sm:$0xff] %v461_v6  ;;  %464 = vst [vmem:[%s3231_s12 + $0x68] sm:$0xff] %v463_v7  ;;  %v467_v9 = vld [vmem:[%s3235_s14 + $0xe8] sm:$0xff]  ;;  %v469_v10 = vld [vmem:[%s3235_s14 + $0x118] sm:$0xff]  ;;  %s2661_s15 = sshll.u32 %s4962_s24, 4 }
  0x3b   : >> { %466 = vst [vmem:[%s3231_s12 + $0x80] sm:$0xff] %v465_v8  ;;  %v471_v11 = vld [vmem:[%s3235_s14 + $0x120] sm:$0xff]  ;;  %468 = vst [vmem:[%s3231_s12 + $0x88] sm:$0xff] %v467_v9  ;;  %v473_v12 = vld [vmem:[%s3235_s14 + $0x150] sm:$0xff]  ;;  %s3496_s30 = scalar_lea.vmem %s3414_s22, %s2661_s15   ;;  %s3499_s0 = scalar_lea.vmem %s3418_s26, %s2661_s15 [#allocation2]  }
  0x3c   : >> { %470 = vst [vmem:[%s3231_s12 + $0xa0] sm:$0xff] %v469_v10  ;;  %472 = vst [vmem:[%s3231_s12 + $0xa8] sm:$0xff] %v471_v11  ;;  %v475_v13 = vld [vmem:[%s3235_s14 + $0x158] sm:$0xff]  ;;  %v477_v14 = vld [vmem:[%s3235_s14 + $0x188] sm:$0xff]  ;;  %s4932_s15 = smov %s4962_s24 }
  0x3d   : >> { %474 = vst [vmem:[%s3231_s12 + $0xc0] sm:$0xff] %v473_v12  ;;  %476 = vst [vmem:[%s3231_s12 + $0xc8] sm:$0xff] %v475_v13  ;;  %v479_v15 = vld [vmem:[%s3235_s14 + $0x190] sm:$0xff]  ;;  %v481_v16 = vld [vmem:[%s3235_s14 + $0x1c0] sm:$0xff] }
  0x3e   : >> { %478 = vst [vmem:[%s3231_s12 + $0xe0] sm:$0xff] %v477_v14  ;;  %v483_v17 = vld [vmem:[%s3235_s14 + $0x1c8] sm:$0xff]  ;;  %480 = vst [vmem:[%s3231_s12 + $0xe8] sm:$0xff] %v479_v15  ;;  %v485_v18 = vld [vmem:[%s3235_s14 + $0x1f8] sm:$0xff] }
  0x3f   : >> { %482 = vst [vmem:[%s3231_s12 + $0x100] sm:$0xff] %v481_v16  ;;  %484 = vst [vmem:[%s3231_s12 + $0x108] sm:$0xff] %v483_v17  ;;  %v487_v19 = vld [vmem:[%s3235_s14 + $0x200] sm:$0xff]  ;;  %v489_v20 = vld [vmem:[%s3235_s14 + $0x230] sm:$0xff] }
  0x40   : >> { %486 = vst [vmem:[%s3231_s12 + $0x120] sm:$0xff] %v485_v18  ;;  %488 = vst [vmem:[%s3231_s12 + $0x128] sm:$0xff] %v487_v19  ;;  %v491_v21 = vld [vmem:[%s3235_s14 + $0x238] sm:$0xff]  ;;  %v493_v22 = vld [vmem:[%s3235_s14 + $0x268] sm:$0xff] }
  0x41   : >> { %490 = vst [vmem:[%s3231_s12 + $0x140] sm:$0xff] %v489_v20  ;;  %v495_v23 = vld [vmem:[%s3235_s14 + $0x270] sm:$0xff]  ;;  %492 = vst [vmem:[%s3231_s12 + $0x148] sm:$0xff] %v491_v21  ;;  %v497_v24 = vld [vmem:[%s3235_s14 + $0x2a0] sm:$0xff] }
  0x42   : >> { %494 = vst [vmem:[%s3231_s12 + $0x160] sm:$0xff] %v493_v22  ;;  %496 = vst [vmem:[%s3231_s12 + $0x168] sm:$0xff] %v495_v23  ;;  %v499_v25 = vld [vmem:[%s3235_s14 + $0x2a8] sm:$0xff]  ;;  %v501_v26 = vld [vmem:[%s3235_s14 + $0x2d8] sm:$0xff] }
  0x43   : >> { %498 = vst [vmem:[%s3231_s12 + $0x180] sm:$0xff] %v497_v24  ;;  %500 = vst [vmem:[%s3231_s12 + $0x188] sm:$0xff] %v499_v25  ;;  %v503_v27 = vld [vmem:[%s3235_s14 + $0x2e0] sm:$0xff]  ;;  %v505_v28 = vld [vmem:[%s3235_s14 + $0x310] sm:$0xff] }
  0x44   : >> { %502 = vst [vmem:[%s3231_s12 + $0x1a0] sm:$0xff] %v501_v26  ;;  %v507_v29 = vld [vmem:[%s3235_s14 + $0x318] sm:$0xff]  ;;  %504 = vst [vmem:[%s3231_s12 + $0x1a8] sm:$0xff] %v503_v27  ;;  %v509_v30 = vld [vmem:[%s3235_s14 + $0x348] sm:$0xff] }
  0x45   : >> { %506 = vst [vmem:[%s3231_s12 + $0x1c0] sm:$0xff] %v505_v28  ;;  %508 = vst [vmem:[%s3231_s12 + $0x1c8] sm:$0xff] %v507_v29  ;;  %v511_v31 = vld [vmem:[%s3235_s14 + $0x350] sm:$0xff]  ;;  %v513_v32 = vld [vmem:[%s3235_s14 + $0x380] sm:$0xff] }
  0x46   : >> { %510 = vst [vmem:[%s3231_s12 + $0x1e0] sm:$0xff] %v509_v30  ;;  %512 = vst [vmem:[%s3231_s12 + $0x1e8] sm:$0xff] %v511_v31  ;;  %v515_v33 = vld [vmem:[%s3235_s14 + $0x388] sm:$0xff]  ;;  %v517_v34 = vld [vmem:[%s3235_s14 + $0x3b8] sm:$0xff] }
  0x47   : >> { %514 = vst [vmem:[%s3231_s12 + $0x200] sm:$0xff] %v513_v32  ;;  %v519_v35 = vld [vmem:[%s3235_s14 + $0x3c0] sm:$0xff]  ;;  %516 = vst [vmem:[%s3231_s12 + $0x208] sm:$0xff] %v515_v33  ;;  %v521_v36 = vld [vmem:[%s3235_s14 + $0x3f0] sm:$0xff] }
  0x48   : >> { %518 = vst [vmem:[%s3231_s12 + $0x220] sm:$0xff] %v517_v34  ;;  %520 = vst [vmem:[%s3231_s12 + $0x228] sm:$0xff] %v519_v35  ;;  %v523_v37 = vld [vmem:[%s3235_s14 + $0x3f8] sm:$0xff]  ;;  %v525_v38 = vld [vmem:[%s3235_s14 + $0x428] sm:$0xff] }
  0x49   : >> { %522 = vst [vmem:[%s3231_s12 + $0x240] sm:$0xff] %v521_v36  ;;  %524 = vst [vmem:[%s3231_s12 + $0x248] sm:$0xff] %v523_v37  ;;  %v527_v39 = vld [vmem:[%s3235_s14 + $0x430] sm:$0xff]  ;;  %v529_v40 = vld [vmem:[%s3235_s14 + $0x460] sm:$0xff] }
  0x4a   : >> { %526 = vst [vmem:[%s3231_s12 + $0x260] sm:$0xff] %v525_v38  ;;  %v531_v41 = vld [vmem:[%s3235_s14 + $0x468] sm:$0xff]  ;;  %528 = vst [vmem:[%s3231_s12 + $0x268] sm:$0xff] %v527_v39  ;;  %v533_v42 = vld [vmem:[%s3235_s14 + $0x498] sm:$0xff] }
  0x4b   : >> { %530 = vst [vmem:[%s3231_s12 + $0x280] sm:$0xff] %v529_v40  ;;  %532 = vst [vmem:[%s3231_s12 + $0x288] sm:$0xff] %v531_v41  ;;  %v535_v43 = vld [vmem:[%s3235_s14 + $0x4a0] sm:$0xff]  ;;  %v537_v44 = vld [vmem:[%s3235_s14 + $0x4d0] sm:$0xff] }
  0x4c   : >> { %534 = vst [vmem:[%s3231_s12 + $0x2a0] sm:$0xff] %v533_v42  ;;  %536 = vst [vmem:[%s3231_s12 + $0x2a8] sm:$0xff] %v535_v43  ;;  %v539_v45 = vld [vmem:[%s3235_s14 + $0x4d8] sm:$0xff]  ;;  %v541_v46 = vld [vmem:[%s3235_s14 + $0x508] sm:$0xff] }
  0x4d   : >> { %538 = vst [vmem:[%s3231_s12 + $0x2c0] sm:$0xff] %v537_v44  ;;  %v543_v47 = vld [vmem:[%s3235_s14 + $0x510] sm:$0xff]  ;;  %540 = vst [vmem:[%s3231_s12 + $0x2c8] sm:$0xff] %v539_v45  ;;  %v545_v48 = vld [vmem:[%s3235_s14 + $0x540] sm:$0xff] }
  0x4e   : >> { %542 = vst [vmem:[%s3231_s12 + $0x2e0] sm:$0xff] %v541_v46  ;;  %544 = vst [vmem:[%s3231_s12 + $0x2e8] sm:$0xff] %v543_v47  ;;  %v547_v49 = vld [vmem:[%s3235_s14 + $0x548] sm:$0xff]  ;;  %v549_v50 = vld [vmem:[%s3235_s14 + $0x578] sm:$0xff] }
  0x4f   : >> { %546 = vst [vmem:[%s3231_s12 + $0x300] sm:$0xff] %v545_v48  ;;  %548 = vst [vmem:[%s3231_s12 + $0x308] sm:$0xff] %v547_v49  ;;  %v551_v51 = vld [vmem:[%s3235_s14 + $0x580] sm:$0xff]  ;;  %v553_v52 = vld [vmem:[%s3235_s14 + $0x5b0] sm:$0xff] }
  0x50   : >> { %550 = vst [vmem:[%s3231_s12 + $0x320] sm:$0xff] %v549_v50  ;;  %v555_v53 = vld [vmem:[%s3235_s14 + $0x5b8] sm:$0xff]  ;;  %552 = vst [vmem:[%s3231_s12 + $0x328] sm:$0xff] %v551_v51  ;;  %v557_v54 = vld [vmem:[%s3235_s14 + $0x5e8] sm:$0xff] }
  0x51   : >> { %554 = vst [vmem:[%s3231_s12 + $0x340] sm:$0xff] %v553_v52  ;;  %556 = vst [vmem:[%s3231_s12 + $0x348] sm:$0xff] %v555_v53  ;;  %v559_v55 = vld [vmem:[%s3235_s14 + $0x5f0] sm:$0xff]  ;;  %v561_v56 = vld [vmem:[%s3235_s14 + $0x620] sm:$0xff] }
  0x52   : >> { %558 = vst [vmem:[%s3231_s12 + $0x360] sm:$0xff] %v557_v54  ;;  %560 = vst [vmem:[%s3231_s12 + $0x368] sm:$0xff] %v559_v55  ;;  %v563_v57 = vld [vmem:[%s3235_s14 + $0x628] sm:$0xff]  ;;  %v565_v58 = vld [vmem:[%s3235_s14 + $0x658] sm:$0xff]  ;;  %445 = sbr.rel (!%p442_p3) target bundleno = 54 (0x36), region = 188 }
  0x53   : >> { %562 = vst [vmem:[%s3231_s12 + $0x380] sm:$0xff] %v561_v56  ;;  %v567_v59 = vld [vmem:[%s3235_s14 + $0x660] sm:$0xff]  ;;  %564 = vst [vmem:[%s3231_s12 + $0x388] sm:$0xff] %v563_v57  ;;  %v569_v60 = vld [vmem:[%s3235_s14 + $0x690] sm:$0xff] }
  0x54   : >> { %566 = vst [vmem:[%s3231_s12 + $0x3a0] sm:$0xff] %v565_v58  ;;  %568 = vst [vmem:[%s3231_s12 + $0x3a8] sm:$0xff] %v567_v59  ;;  %v571_v61 = vld [vmem:[%s3235_s14 + $0x698] sm:$0xff]  ;;  %v573_v62 = vld [vmem:[%s3235_s14 + $0x6c8] sm:$0xff] }
  0x55   : >> { %570 = vst [vmem:[%s3231_s12 + $0x3c0] sm:$0xff] %v569_v60  ;;  %572 = vst [vmem:[%s3231_s12 + $0x3c8] sm:$0xff] %v571_v61  ;;  %v575_v63 = vld [vmem:[%s3235_s14 + $0x6d0] sm:$0xff]  ;;  %s4931_s14 = smov %s3496_s30 }
  0x56   : >> { %574 = vst [vmem:[%s3231_s12 + $0x3e0] sm:$0xff] %v573_v62  ;;  %576 = vst [vmem:[%s3231_s12 + $0x3e8] sm:$0xff] %v575_v63  ;;  %s4930_s12 = smov %s3499_s0 }
  0x57 PF: > { %s4933_s19 = sshrl.u32 %s3416_s25, 3  ;;  %s2750_s28 = sshll.u32 %s3429_s13, 8 }
  0x58   : > { %s3605_s23 = sand.u32 1, %s4933_s19   ;;  %s588_s17 = sshra.s32 %s2750_s28, 4 }
  0x59   : > { %s3609_s11 = scalar_lea.vmem %s3414_s22, %s588_s17   ;;  %s3612_s0 = scalar_lea.vmem %s3418_s26, %s588_s17 [#allocation2]  }
  0x5a   : > { %p2666_p4 = scmp.le.s32.totalorder %s3605_s23, 0 }
  0x5b   : > { %s4934_s30 = smov (!%p2666_p4), %s3612_s0  ;;  %s4935_s12 = smov (!%p2666_p4), %s3609_s11 }
  0x5c   : > { %2591 = sbr.rel (%p2666_p4) target bundleno = 114 (0x72), region = 193  ;;  %s3621_s14 = smov (!%p2666_p4), 0  }
  0x5d   : > { %s3623_s16 = smov (!%p2666_p4), 0  }
  0x61 LB: >> { %v604_v0 = vld [vmem:[%s3251_s12] sm:$0xff]  ;;  %v606_v1 = vld [vmem:[%s3251_s12 + $0x38] sm:$0xff]  ;;  %v608_v2 = vld [vmem:[%s3251_s12 + $0x70] sm:$0xff]  ;;  %s668_s17 = sadd.s32 1, %s3255_s14  ;;  %s598_s16 = sadd.s32 1, %s3259_s16   ;;  %s3259_s16 = sphi %s3623_s16, %s598_s16   ;;  %s3255_s14 = sphi %s3621_s14, %s4938_s14   ;;  %s3251_s12 = sphi %s4935_s12, %s4937_s12   ;;  %s3247_s30 = sphi %s4934_s30, %s4936_s30  }
  0x62   : >> { %605 = vst [vmem:[%s3247_s30] sm:$0xff] %v604_v0  ;;  %607 = vst [vmem:[%s3247_s30 + $0x20] sm:$0xff] %v606_v1  ;;  %v610_v3 = vld [vmem:[%s3251_s12 + $0xa8] sm:$0xff]  ;;  %v612_v4 = vld [vmem:[%s3251_s12 + $0xe0] sm:$0xff]  ;;  %p669_p5 = scmp.ge.s32.totalorder %s668_s17, %s3605_s23  ;;  %p597_p7 = scmp.ge.s32.totalorder %s598_s16, %s3605_s23 }
  0x63   : >> { %609 = vst [vmem:[%s3247_s30 + $0x40] sm:$0xff] %v608_v2  ;;  %v614_v5 = vld [vmem:[%s3251_s12 + $0x118] sm:$0xff]  ;;  %611 = vst [vmem:[%s3247_s30 + $0x60] sm:$0xff] %v610_v3  ;;  %v616_v6 = vld [vmem:[%s3251_s12 + $0x150] sm:$0xff] }
  0x64   : >> { %613 = vst [vmem:[%s3247_s30 + $0x80] sm:$0xff] %v612_v4  ;;  %615 = vst [vmem:[%s3247_s30 + $0xa0] sm:$0xff] %v614_v5  ;;  %v618_v7 = vld [vmem:[%s3251_s12 + $0x188] sm:$0xff]  ;;  %v620_v8 = vld [vmem:[%s3251_s12 + $0x1c0] sm:$0xff]  ;;  %s4964_s17 = smov (%p669_p5, %s668_s17), 0 }
  0x65   : >> { %617 = vst [vmem:[%s3247_s30 + $0xc0] sm:$0xff] %v616_v6  ;;  %619 = vst [vmem:[%s3247_s30 + $0xe0] sm:$0xff] %v618_v7  ;;  %v622_v9 = vld [vmem:[%s3251_s12 + $0x1f8] sm:$0xff]  ;;  %v624_v10 = vld [vmem:[%s3251_s12 + $0x230] sm:$0xff]  ;;  %s2667_s19 = sshll.u32 %s4964_s17, 3  ;;  %s4938_s14 = smov %s4964_s17 }
  0x66   : >> { %621 = vst [vmem:[%s3247_s30 + $0x100] sm:$0xff] %v620_v8  ;;  %v626_v11 = vld [vmem:[%s3251_s12 + $0x268] sm:$0xff]  ;;  %623 = vst [vmem:[%s3247_s30 + $0x120] sm:$0xff] %v622_v9  ;;  %v628_v12 = vld [vmem:[%s3251_s12 + $0x2a0] sm:$0xff]  ;;  %s3679_s28 = scalar_lea.vmem %s3609_s11, %s2667_s19   ;;  %s674_s13 = scalar_lea.vmem %s3612_s0, %s2667_s19 [#allocation2]  }
  0x67   : >> { %625 = vst [vmem:[%s3247_s30 + $0x140] sm:$0xff] %v624_v10  ;;  %627 = vst [vmem:[%s3247_s30 + $0x160] sm:$0xff] %v626_v11  ;;  %v630_v13 = vld [vmem:[%s3251_s12 + $0x2d8] sm:$0xff]  ;;  %v632_v14 = vld [vmem:[%s3251_s12 + $0x310] sm:$0xff] }
  0x68   : >> { %629 = vst [vmem:[%s3247_s30 + $0x180] sm:$0xff] %v628_v12  ;;  %631 = vst [vmem:[%s3247_s30 + $0x1a0] sm:$0xff] %v630_v13  ;;  %v634_v15 = vld [vmem:[%s3251_s12 + $0x348] sm:$0xff]  ;;  %v636_v16 = vld [vmem:[%s3251_s12 + $0x380] sm:$0xff] }
  0x69   : >> { %633 = vst [vmem:[%s3247_s30 + $0x1c0] sm:$0xff] %v632_v14  ;;  %v638_v17 = vld [vmem:[%s3251_s12 + $0x3b8] sm:$0xff]  ;;  %635 = vst [vmem:[%s3247_s30 + $0x1e0] sm:$0xff] %v634_v15  ;;  %v640_v18 = vld [vmem:[%s3251_s12 + $0x3f0] sm:$0xff] }
  0x6a   : >> { %637 = vst [vmem:[%s3247_s30 + $0x200] sm:$0xff] %v636_v16  ;;  %639 = vst [vmem:[%s3247_s30 + $0x220] sm:$0xff] %v638_v17  ;;  %v642_v19 = vld [vmem:[%s3251_s12 + $0x428] sm:$0xff]  ;;  %v644_v20 = vld [vmem:[%s3251_s12 + $0x460] sm:$0xff] }
  0x6b   : >> { %641 = vst [vmem:[%s3247_s30 + $0x240] sm:$0xff] %v640_v18  ;;  %643 = vst [vmem:[%s3247_s30 + $0x260] sm:$0xff] %v642_v19  ;;  %v646_v21 = vld [vmem:[%s3251_s12 + $0x498] sm:$0xff]  ;;  %v648_v22 = vld [vmem:[%s3251_s12 + $0x4d0] sm:$0xff] }
  0x6c   : >> { %645 = vst [vmem:[%s3247_s30 + $0x280] sm:$0xff] %v644_v20  ;;  %v650_v23 = vld [vmem:[%s3251_s12 + $0x508] sm:$0xff]  ;;  %647 = vst [vmem:[%s3247_s30 + $0x2a0] sm:$0xff] %v646_v21  ;;  %v652_v24 = vld [vmem:[%s3251_s12 + $0x540] sm:$0xff] }
  0x6d   : >> { %649 = vst [vmem:[%s3247_s30 + $0x2c0] sm:$0xff] %v648_v22  ;;  %651 = vst [vmem:[%s3247_s30 + $0x2e0] sm:$0xff] %v650_v23  ;;  %v654_v25 = vld [vmem:[%s3251_s12 + $0x578] sm:$0xff]  ;;  %v656_v26 = vld [vmem:[%s3251_s12 + $0x5b0] sm:$0xff]  ;;  %600 = sbr.rel (!%p597_p7) target bundleno = 97 (0x61), region = 199 }
  0x6e   : >> { %653 = vst [vmem:[%s3247_s30 + $0x300] sm:$0xff] %v652_v24  ;;  %655 = vst [vmem:[%s3247_s30 + $0x320] sm:$0xff] %v654_v25  ;;  %v658_v27 = vld [vmem:[%s3251_s12 + $0x5e8] sm:$0xff]  ;;  %v660_v28 = vld [vmem:[%s3251_s12 + $0x620] sm:$0xff] }
  0x6f   : >> { %657 = vst [vmem:[%s3247_s30 + $0x340] sm:$0xff] %v656_v26  ;;  %v662_v29 = vld [vmem:[%s3251_s12 + $0x658] sm:$0xff]  ;;  %659 = vst [vmem:[%s3247_s30 + $0x360] sm:$0xff] %v658_v27  ;;  %v664_v30 = vld [vmem:[%s3251_s12 + $0x690] sm:$0xff] }
  0x70   : >> { %661 = vst [vmem:[%s3247_s30 + $0x380] sm:$0xff] %v660_v28  ;;  %663 = vst [vmem:[%s3247_s30 + $0x3a0] sm:$0xff] %v662_v29  ;;  %v666_v31 = vld [vmem:[%s3251_s12 + $0x6c8] sm:$0xff]  ;;  %s4937_s12 = smov %s3679_s28 }
  0x71   : >> { %665 = vst [vmem:[%s3247_s30 + $0x3c0] sm:$0xff] %v664_v30  ;;  %667 = vst [vmem:[%s3247_s30 + $0x3e0] sm:$0xff] %v666_v31  ;;  %s4936_s30 = smov %s674_s13 }
  0x72 PF: > { %677 = sbr.rel (%p432_p13) target bundleno = 217 (0xd9), region = 101  ;;  %s679_s24 = ssub.s32 (!%p432_p13), %s3416_s25, %s3422_s29 }
  0x73   : > { %s683_s15 = sshrl.u32 (!%p432_p13), %s3416_s25, 3  ;;  %s3725_s19 = scalar_lea.vmem (!%p432_p13), %s3414_s22, %s679_s24 }
  0x74   : > { %s3728_s28 = scalar_lea.vmem (!%p432_p13), %s3418_s26, %s679_s24 [#allocation2]  ;;  %s3732_s16 = sshrl.u32 (!%p432_p13), %s683_s15, 1 }
  0x75   : > { %p2669_p10 = scmp.le.s32.totalorder (!%p432_p13), %s3732_s16, 0 }
  0x77   : > { %2605 = sbr.rel (%p2669_p10) target bundleno = 157 (0x9d), region = 204  ;;  %s4939_s11 = smov (!%p2669_p10), %s3418_s26 }
  0x78   : > { %s4940_s23 = smov (!%p2669_p10), %s3414_s22  ;;  %s3741_s0 = smov (!%p2669_p10), 0  }
  0x79   : > { %s3743_s30 = smov (!%p2669_p10), 0  }
  0x7c LB: >> { %v696_v32 = vld [vmem:[%s3267_s23] sm:$0xff]  ;;  %v698_v33 = vld [vmem:[%s3267_s23 + $0x8] sm:$0xff]  ;;  %v700_v34 = vld [vmem:[%s3267_s23 + $0x38] sm:$0xff]  ;;  %s824_s12 = sadd.s32 1, %s3271_s0  ;;  %s690_s30 = sadd.s32 1, %s3275_s30   ;;  %s3275_s30 = sphi %s3743_s30, %s690_s30   ;;  %s3271_s0 = sphi %s3741_s0, %s4943_s0   ;;  %s3267_s23 = sphi %s4940_s23, %s4942_s23   ;;  %s3263_s11 = sphi %s4939_s11, %s4941_s11  }
  0x7d   : >> { %697 = vst [vmem:[%s3263_s11] sm:$0xff] %v696_v32  ;;  %699 = vst [vmem:[%s3263_s11 + $0x8] sm:$0xff] %v698_v33  ;;  %v702_v35 = vld [vmem:[%s3267_s23 + $0x40] sm:$0xff]  ;;  %v704_v36 = vld [vmem:[%s3267_s23 + $0x70] sm:$0xff]  ;;  %p825_p11 = scmp.ge.s32.totalorder %s824_s12, %s3732_s16  ;;  %p689_p12 = scmp.ge.s32.totalorder %s690_s30, %s3732_s16 }
  0x7e   : >> { %701 = vst [vmem:[%s3263_s11 + $0x20] sm:$0xff] %v700_v34  ;;  %v706_v37 = vld [vmem:[%s3267_s23 + $0x78] sm:$0xff]  ;;  %703 = vst [vmem:[%s3263_s11 + $0x28] sm:$0xff] %v702_v35  ;;  %v708_v38 = vld [vmem:[%s3267_s23 + $0xa8] sm:$0xff] }
  0x7f   : >> { %705 = vst [vmem:[%s3263_s11 + $0x40] sm:$0xff] %v704_v36  ;;  %707 = vst [vmem:[%s3263_s11 + $0x48] sm:$0xff] %v706_v37  ;;  %v710_v39 = vld [vmem:[%s3267_s23 + $0xb0] sm:$0xff]  ;;  %v712_v40 = vld [vmem:[%s3267_s23 + $0xe0] sm:$0xff]  ;;  %s4966_s12 = smov (%p825_p11, %s824_s12), 0 }
  0x80   : >> { %709 = vst [vmem:[%s3263_s11 + $0x60] sm:$0xff] %v708_v38  ;;  %711 = vst [vmem:[%s3263_s11 + $0x68] sm:$0xff] %v710_v39  ;;  %v714_v41 = vld [vmem:[%s3267_s23 + $0xe8] sm:$0xff]  ;;  %v716_v42 = vld [vmem:[%s3267_s23 + $0x118] sm:$0xff]  ;;  %s2670_s14 = sshll.u32 %s4966_s12, 4  ;;  %s4943_s0 = smov %s4966_s12 }
  0x81   : >> { %713 = vst [vmem:[%s3263_s11 + $0x80] sm:$0xff] %v712_v40  ;;  %v718_v43 = vld [vmem:[%s3267_s23 + $0x120] sm:$0xff]  ;;  %715 = vst [vmem:[%s3263_s11 + $0x88] sm:$0xff] %v714_v41  ;;  %v720_v44 = vld [vmem:[%s3267_s23 + $0x150] sm:$0xff]  ;;  %s3799_s17 = scalar_lea.vmem %s3414_s22, %s2670_s14   ;;  %s3802_s13 = scalar_lea.vmem %s3418_s26, %s2670_s14 [#allocation2]  }
  0x82   : >> { %717 = vst [vmem:[%s3263_s11 + $0xa0] sm:$0xff] %v716_v42  ;;  %719 = vst [vmem:[%s3263_s11 + $0xa8] sm:$0xff] %v718_v43  ;;  %v722_v45 = vld [vmem:[%s3267_s23 + $0x158] sm:$0xff]  ;;  %v724_v46 = vld [vmem:[%s3267_s23 + $0x188] sm:$0xff] }
  0x83   : >> { %721 = vst [vmem:[%s3263_s11 + $0xc0] sm:$0xff] %v720_v44  ;;  %723 = vst [vmem:[%s3263_s11 + $0xc8] sm:$0xff] %v722_v45  ;;  %v726_v47 = vld [vmem:[%s3267_s23 + $0x190] sm:$0xff]  ;;  %v728_v48 = vld [vmem:[%s3267_s23 + $0x1c0] sm:$0xff] }
  0x84   : >> { %725 = vst [vmem:[%s3263_s11 + $0xe0] sm:$0xff] %v724_v46  ;;  %v730_v49 = vld [vmem:[%s3267_s23 + $0x1c8] sm:$0xff]  ;;  %727 = vst [vmem:[%s3263_s11 + $0xe8] sm:$0xff] %v726_v47  ;;  %v732_v50 = vld [vmem:[%s3267_s23 + $0x1f8] sm:$0xff] }
  0x85   : >> { %729 = vst [vmem:[%s3263_s11 + $0x100] sm:$0xff] %v728_v48  ;;  %731 = vst [vmem:[%s3263_s11 + $0x108] sm:$0xff] %v730_v49  ;;  %v734_v51 = vld [vmem:[%s3267_s23 + $0x200] sm:$0xff]  ;;  %v736_v52 = vld [vmem:[%s3267_s23 + $0x230] sm:$0xff] }
  0x86   : >> { %733 = vst [vmem:[%s3263_s11 + $0x120] sm:$0xff] %v732_v50  ;;  %735 = vst [vmem:[%s3263_s11 + $0x128] sm:$0xff] %v734_v51  ;;  %v738_v53 = vld [vmem:[%s3267_s23 + $0x238] sm:$0xff]  ;;  %v740_v54 = vld [vmem:[%s3267_s23 + $0x268] sm:$0xff] }
  0x87   : >> { %737 = vst [vmem:[%s3263_s11 + $0x140] sm:$0xff] %v736_v52  ;;  %v742_v55 = vld [vmem:[%s3267_s23 + $0x270] sm:$0xff]  ;;  %739 = vst [vmem:[%s3263_s11 + $0x148] sm:$0xff] %v738_v53  ;;  %v744_v56 = vld [vmem:[%s3267_s23 + $0x2a0] sm:$0xff] }
  0x88   : >> { %741 = vst [vmem:[%s3263_s11 + $0x160] sm:$0xff] %v740_v54  ;;  %743 = vst [vmem:[%s3263_s11 + $0x168] sm:$0xff] %v742_v55  ;;  %v746_v57 = vld [vmem:[%s3267_s23 + $0x2a8] sm:$0xff]  ;;  %v748_v58 = vld [vmem:[%s3267_s23 + $0x2d8] sm:$0xff] }
  0x89   : >> { %745 = vst [vmem:[%s3263_s11 + $0x180] sm:$0xff] %v744_v56  ;;  %747 = vst [vmem:[%s3263_s11 + $0x188] sm:$0xff] %v746_v57  ;;  %v750_v59 = vld [vmem:[%s3267_s23 + $0x2e0] sm:$0xff]  ;;  %v752_v60 = vld [vmem:[%s3267_s23 + $0x310] sm:$0xff] }
  0x8a   : >> { %749 = vst [vmem:[%s3263_s11 + $0x1a0] sm:$0xff] %v748_v58  ;;  %v754_v61 = vld [vmem:[%s3267_s23 + $0x318] sm:$0xff]  ;;  %751 = vst [vmem:[%s3263_s11 + $0x1a8] sm:$0xff] %v750_v59  ;;  %v756_v62 = vld [vmem:[%s3267_s23 + $0x348] sm:$0xff] }
  0x8b   : >> { %753 = vst [vmem:[%s3263_s11 + $0x1c0] sm:$0xff] %v752_v60  ;;  %755 = vst [vmem:[%s3263_s11 + $0x1c8] sm:$0xff] %v754_v61  ;;  %v758_v63 = vld [vmem:[%s3267_s23 + $0x350] sm:$0xff]  ;;  %v760_v0 = vld [vmem:[%s3267_s23 + $0x380] sm:$0xff] }
  0x8c   : >> { %757 = vst [vmem:[%s3263_s11 + $0x1e0] sm:$0xff] %v756_v62  ;;  %759 = vst [vmem:[%s3263_s11 + $0x1e8] sm:$0xff] %v758_v63  ;;  %v762_v1 = vld [vmem:[%s3267_s23 + $0x388] sm:$0xff]  ;;  %v764_v2 = vld [vmem:[%s3267_s23 + $0x3b8] sm:$0xff] }
  0x8d   : >> { %761 = vst [vmem:[%s3263_s11 + $0x200] sm:$0xff] %v760_v0  ;;  %v766_v3 = vld [vmem:[%s3267_s23 + $0x3c0] sm:$0xff]  ;;  %763 = vst [vmem:[%s3263_s11 + $0x208] sm:$0xff] %v762_v1  ;;  %v768_v4 = vld [vmem:[%s3267_s23 + $0x3f0] sm:$0xff] }
  0x8e   : >> { %765 = vst [vmem:[%s3263_s11 + $0x220] sm:$0xff] %v764_v2  ;;  %767 = vst [vmem:[%s3263_s11 + $0x228] sm:$0xff] %v766_v3  ;;  %v770_v5 = vld [vmem:[%s3267_s23 + $0x3f8] sm:$0xff]  ;;  %v772_v6 = vld [vmem:[%s3267_s23 + $0x428] sm:$0xff] }
  0x8f   : >> { %769 = vst [vmem:[%s3263_s11 + $0x240] sm:$0xff] %v768_v4  ;;  %771 = vst [vmem:[%s3263_s11 + $0x248] sm:$0xff] %v770_v5  ;;  %v774_v7 = vld [vmem:[%s3267_s23 + $0x430] sm:$0xff]  ;;  %v776_v8 = vld [vmem:[%s3267_s23 + $0x460] sm:$0xff] }
  0x90   : >> { %773 = vst [vmem:[%s3263_s11 + $0x260] sm:$0xff] %v772_v6  ;;  %v778_v9 = vld [vmem:[%s3267_s23 + $0x468] sm:$0xff]  ;;  %775 = vst [vmem:[%s3263_s11 + $0x268] sm:$0xff] %v774_v7  ;;  %v780_v10 = vld [vmem:[%s3267_s23 + $0x498] sm:$0xff] }
  0x91   : >> { %777 = vst [vmem:[%s3263_s11 + $0x280] sm:$0xff] %v776_v8  ;;  %779 = vst [vmem:[%s3263_s11 + $0x288] sm:$0xff] %v778_v9  ;;  %v782_v11 = vld [vmem:[%s3267_s23 + $0x4a0] sm:$0xff]  ;;  %v784_v12 = vld [vmem:[%s3267_s23 + $0x4d0] sm:$0xff] }
  0x92   : >> { %781 = vst [vmem:[%s3263_s11 + $0x2a0] sm:$0xff] %v780_v10  ;;  %783 = vst [vmem:[%s3263_s11 + $0x2a8] sm:$0xff] %v782_v11  ;;  %v786_v13 = vld [vmem:[%s3267_s23 + $0x4d8] sm:$0xff]  ;;  %v788_v14 = vld [vmem:[%s3267_s23 + $0x508] sm:$0xff] }
  0x93   : >> { %785 = vst [vmem:[%s3263_s11 + $0x2c0] sm:$0xff] %v784_v12  ;;  %v790_v15 = vld [vmem:[%s3267_s23 + $0x510] sm:$0xff]  ;;  %787 = vst [vmem:[%s3263_s11 + $0x2c8] sm:$0xff] %v786_v13  ;;  %v792_v16 = vld [vmem:[%s3267_s23 + $0x540] sm:$0xff] }
  0x94   : >> { %789 = vst [vmem:[%s3263_s11 + $0x2e0] sm:$0xff] %v788_v14  ;;  %791 = vst [vmem:[%s3263_s11 + $0x2e8] sm:$0xff] %v790_v15  ;;  %v794_v17 = vld [vmem:[%s3267_s23 + $0x548] sm:$0xff]  ;;  %v796_v18 = vld [vmem:[%s3267_s23 + $0x578] sm:$0xff] }
  0x95   : >> { %793 = vst [vmem:[%s3263_s11 + $0x300] sm:$0xff] %v792_v16  ;;  %795 = vst [vmem:[%s3263_s11 + $0x308] sm:$0xff] %v794_v17  ;;  %v798_v19 = vld [vmem:[%s3267_s23 + $0x580] sm:$0xff]  ;;  %v800_v20 = vld [vmem:[%s3267_s23 + $0x5b0] sm:$0xff] }
  0x96   : >> { %797 = vst [vmem:[%s3263_s11 + $0x320] sm:$0xff] %v796_v18  ;;  %v802_v21 = vld [vmem:[%s3267_s23 + $0x5b8] sm:$0xff]  ;;  %799 = vst [vmem:[%s3263_s11 + $0x328] sm:$0xff] %v798_v19  ;;  %v804_v22 = vld [vmem:[%s3267_s23 + $0x5e8] sm:$0xff] }
  0x97   : >> { %801 = vst [vmem:[%s3263_s11 + $0x340] sm:$0xff] %v800_v20  ;;  %803 = vst [vmem:[%s3263_s11 + $0x348] sm:$0xff] %v802_v21  ;;  %v806_v23 = vld [vmem:[%s3267_s23 + $0x5f0] sm:$0xff]  ;;  %v808_v24 = vld [vmem:[%s3267_s23 + $0x620] sm:$0xff] }
  0x98   : >> { %805 = vst [vmem:[%s3263_s11 + $0x360] sm:$0xff] %v804_v22  ;;  %807 = vst [vmem:[%s3263_s11 + $0x368] sm:$0xff] %v806_v23  ;;  %v810_v25 = vld [vmem:[%s3267_s23 + $0x628] sm:$0xff]  ;;  %v812_v26 = vld [vmem:[%s3267_s23 + $0x658] sm:$0xff]  ;;  %692 = sbr.rel (!%p689_p12) target bundleno = 124 (0x7c), region = 210 }
  0x99   : >> { %809 = vst [vmem:[%s3263_s11 + $0x380] sm:$0xff] %v808_v24  ;;  %v814_v27 = vld [vmem:[%s3267_s23 + $0x660] sm:$0xff]  ;;  %811 = vst [vmem:[%s3263_s11 + $0x388] sm:$0xff] %v810_v25  ;;  %v816_v28 = vld [vmem:[%s3267_s23 + $0x690] sm:$0xff] }
  0x9a   : >> { %813 = vst [vmem:[%s3263_s11 + $0x3a0] sm:$0xff] %v812_v26  ;;  %815 = vst [vmem:[%s3263_s11 + $0x3a8] sm:$0xff] %v814_v27  ;;  %v818_v29 = vld [vmem:[%s3267_s23 + $0x698] sm:$0xff]  ;;  %v820_v30 = vld [vmem:[%s3267_s23 + $0x6c8] sm:$0xff] }
  0x9b   : >> { %817 = vst [vmem:[%s3263_s11 + $0x3c0] sm:$0xff] %v816_v28  ;;  %819 = vst [vmem:[%s3263_s11 + $0x3c8] sm:$0xff] %v818_v29  ;;  %v822_v31 = vld [vmem:[%s3267_s23 + $0x6d0] sm:$0xff]  ;;  %s4942_s23 = smov %s3799_s17 }
  0x9c   : >> { %821 = vst [vmem:[%s3263_s11 + $0x3e0] sm:$0xff] %v820_v30  ;;  %823 = vst [vmem:[%s3263_s11 + $0x3e8] sm:$0xff] %v822_v31  ;;  %s4941_s11 = smov %s3802_s13 }
  0x9d PF: > { %s3908_s24 = sand.u32 1, %s683_s15   ;;  %s2752_s14 = sshll.u32 %s3732_s16, 8 }
  0x9e   : > { %s835_s21 = sshra.s32 %s2752_s14, 4  ;;  %p2675_p13 = scmp.le.s32.totalorder %s3908_s24, 0 }
  0x9f   : > { %s3912_s27 = scalar_lea.vmem %s3414_s22, %s835_s21   ;;  %s3915_s13 = scalar_lea.vmem %s3418_s26, %s835_s21 [#allocation2]  }
  0xa0   : > { %2619 = sbr.rel (%p2675_p13) target bundleno = 182 (0xb6), region = 215  ;;  %s4944_s11 = smov (!%p2675_p13), %s3915_s13 }
  0xa1   : > { %s4945_s23 = smov (!%p2675_p13), %s3912_s27  ;;  %s3924_s0 = smov (!%p2675_p13), 0  }
  0xa2   : > { %s3926_s30 = smov (!%p2675_p13), 0  }
  0xa5 LB: >> { %v851_v32 = vld [vmem:[%s3283_s23] sm:$0xff]  ;;  %v853_v33 = vld [vmem:[%s3283_s23 + $0x38] sm:$0xff]  ;;  %v855_v34 = vld [vmem:[%s3283_s23 + $0x70] sm:$0xff]  ;;  %s915_s21 = sadd.s32 1, %s3287_s0  ;;  %s845_s30 = sadd.s32 1, %s3291_s30   ;;  %s3291_s30 = sphi %s3926_s30, %s845_s30   ;;  %s3287_s0 = sphi %s3924_s0, %s4948_s0   ;;  %s3283_s23 = sphi %s4945_s23, %s4947_s23   ;;  %s3279_s11 = sphi %s4944_s11, %s4946_s11  }
  0xa6   : >> { %852 = vst [vmem:[%s3279_s11] sm:$0xff] %v851_v32  ;;  %854 = vst [vmem:[%s3279_s11 + $0x20] sm:$0xff] %v853_v33  ;;  %v857_v35 = vld [vmem:[%s3283_s23 + $0xa8] sm:$0xff]  ;;  %v859_v36 = vld [vmem:[%s3283_s23 + $0xe0] sm:$0xff]  ;;  %p916_p0 = scmp.ge.s32.totalorder %s915_s21, %s3908_s24  ;;  %p844_p1 = scmp.ge.s32.totalorder %s845_s30, %s3908_s24 }
  0xa7   : >> { %856 = vst [vmem:[%s3279_s11 + $0x40] sm:$0xff] %v855_v34  ;;  %v861_v37 = vld [vmem:[%s3283_s23 + $0x118] sm:$0xff]  ;;  %858 = vst [vmem:[%s3279_s11 + $0x60] sm:$0xff] %v857_v35  ;;  %v863_v38 = vld [vmem:[%s3283_s23 + $0x150] sm:$0xff] }
  0xa8   : >> { %860 = vst [vmem:[%s3279_s11 + $0x80] sm:$0xff] %v859_v36  ;;  %862 = vst [vmem:[%s3279_s11 + $0xa0] sm:$0xff] %v861_v37  ;;  %v865_v39 = vld [vmem:[%s3283_s23 + $0x188] sm:$0xff]  ;;  %v867_v40 = vld [vmem:[%s3283_s23 + $0x1c0] sm:$0xff]  ;;  %s4968_s21 = smov (%p916_p0, %s915_s21), 0 }
  0xa9   : >> { %864 = vst [vmem:[%s3279_s11 + $0xc0] sm:$0xff] %v863_v38  ;;  %866 = vst [vmem:[%s3279_s11 + $0xe0] sm:$0xff] %v865_v39  ;;  %v869_v41 = vld [vmem:[%s3283_s23 + $0x1f8] sm:$0xff]  ;;  %v871_v42 = vld [vmem:[%s3283_s23 + $0x230] sm:$0xff]  ;;  %s2676_s15 = sshll.u32 %s4968_s21, 3  ;;  %s4948_s0 = smov %s4968_s21 }
  0xaa   : >> { %868 = vst [vmem:[%s3279_s11 + $0x100] sm:$0xff] %v867_v40  ;;  %v873_v43 = vld [vmem:[%s3283_s23 + $0x268] sm:$0xff]  ;;  %870 = vst [vmem:[%s3279_s11 + $0x120] sm:$0xff] %v869_v41  ;;  %v875_v44 = vld [vmem:[%s3283_s23 + $0x2a0] sm:$0xff]  ;;  %s3982_s16 = scalar_lea.vmem %s3912_s27, %s2676_s15   ;;  %s921_s12 = scalar_lea.vmem %s3915_s13, %s2676_s15 [#allocation2]  }
  0xab   : >> { %872 = vst [vmem:[%s3279_s11 + $0x140] sm:$0xff] %v871_v42  ;;  %874 = vst [vmem:[%s3279_s11 + $0x160] sm:$0xff] %v873_v43  ;;  %v877_v45 = vld [vmem:[%s3283_s23 + $0x2d8] sm:$0xff]  ;;  %v879_v46 = vld [vmem:[%s3283_s23 + $0x310] sm:$0xff] }
  0xac   : >> { %876 = vst [vmem:[%s3279_s11 + $0x180] sm:$0xff] %v875_v44  ;;  %878 = vst [vmem:[%s3279_s11 + $0x1a0] sm:$0xff] %v877_v45  ;;  %v881_v47 = vld [vmem:[%s3283_s23 + $0x348] sm:$0xff]  ;;  %v883_v48 = vld [vmem:[%s3283_s23 + $0x380] sm:$0xff] }
  0xad   : >> { %880 = vst [vmem:[%s3279_s11 + $0x1c0] sm:$0xff] %v879_v46  ;;  %v885_v49 = vld [vmem:[%s3283_s23 + $0x3b8] sm:$0xff]  ;;  %882 = vst [vmem:[%s3279_s11 + $0x1e0] sm:$0xff] %v881_v47  ;;  %v887_v50 = vld [vmem:[%s3283_s23 + $0x3f0] sm:$0xff] }
  0xae   : >> { %884 = vst [vmem:[%s3279_s11 + $0x200] sm:$0xff] %v883_v48  ;;  %886 = vst [vmem:[%s3279_s11 + $0x220] sm:$0xff] %v885_v49  ;;  %v889_v51 = vld [vmem:[%s3283_s23 + $0x428] sm:$0xff]  ;;  %v891_v52 = vld [vmem:[%s3283_s23 + $0x460] sm:$0xff] }
  0xaf   : >> { %888 = vst [vmem:[%s3279_s11 + $0x240] sm:$0xff] %v887_v50  ;;  %890 = vst [vmem:[%s3279_s11 + $0x260] sm:$0xff] %v889_v51  ;;  %v893_v53 = vld [vmem:[%s3283_s23 + $0x498] sm:$0xff]  ;;  %v895_v54 = vld [vmem:[%s3283_s23 + $0x4d0] sm:$0xff] }
  0xb0   : >> { %892 = vst [vmem:[%s3279_s11 + $0x280] sm:$0xff] %v891_v52  ;;  %v897_v55 = vld [vmem:[%s3283_s23 + $0x508] sm:$0xff]  ;;  %894 = vst [vmem:[%s3279_s11 + $0x2a0] sm:$0xff] %v893_v53  ;;  %v899_v56 = vld [vmem:[%s3283_s23 + $0x540] sm:$0xff] }
  0xb1   : >> { %896 = vst [vmem:[%s3279_s11 + $0x2c0] sm:$0xff] %v895_v54  ;;  %898 = vst [vmem:[%s3279_s11 + $0x2e0] sm:$0xff] %v897_v55  ;;  %v901_v57 = vld [vmem:[%s3283_s23 + $0x578] sm:$0xff]  ;;  %v903_v58 = vld [vmem:[%s3283_s23 + $0x5b0] sm:$0xff]  ;;  %847 = sbr.rel (!%p844_p1) target bundleno = 165 (0xa5), region = 221 }
  0xb2   : >> { %900 = vst [vmem:[%s3279_s11 + $0x300] sm:$0xff] %v899_v56  ;;  %902 = vst [vmem:[%s3279_s11 + $0x320] sm:$0xff] %v901_v57  ;;  %v905_v59 = vld [vmem:[%s3283_s23 + $0x5e8] sm:$0xff]  ;;  %v907_v60 = vld [vmem:[%s3283_s23 + $0x620] sm:$0xff] }
  0xb3   : >> { %904 = vst [vmem:[%s3279_s11 + $0x340] sm:$0xff] %v903_v58  ;;  %v909_v61 = vld [vmem:[%s3283_s23 + $0x658] sm:$0xff]  ;;  %906 = vst [vmem:[%s3279_s11 + $0x360] sm:$0xff] %v905_v59  ;;  %v911_v62 = vld [vmem:[%s3283_s23 + $0x690] sm:$0xff] }
  0xb4   : >> { %908 = vst [vmem:[%s3279_s11 + $0x380] sm:$0xff] %v907_v60  ;;  %910 = vst [vmem:[%s3279_s11 + $0x3a0] sm:$0xff] %v909_v61  ;;  %v913_v63 = vld [vmem:[%s3283_s23 + $0x6c8] sm:$0xff]  ;;  %s4947_s23 = smov %s3982_s16 }
  0xb5   : >> { %912 = vst [vmem:[%s3279_s11 + $0x3c0] sm:$0xff] %v911_v62  ;;  %914 = vst [vmem:[%s3279_s11 + $0x3e0] sm:$0xff] %v913_v63  ;;  %s4946_s11 = smov %s921_s12 }
  0xb6 PF: > { %s3293_s17 = smov 1  }
  0xb7   : > { %s922_s14 = sshll.u32 %s3293_s17, %s3422_s29 }
  0xb8   : > { %s4023_s30 = sadd.s32 4294967295, %s922_s14 }
  0xb9   : > { %v932_v0 = vld [vmem:[%s3725_s19] sm:%s4023_s30]  ;;  %v934_v1 = vld [vmem:[%s3725_s19 + $0x38] sm:%s4023_s30] }
  0xba   : > { %933 = vst [vmem:[%s3728_s28] sm:%s4023_s30] %v932_v0  ;;  %935 = vst [vmem:[%s3728_s28 + $0x20] sm:%s4023_s30] %v934_v1 }
  0xbb   : > { %v936_v2 = vld [vmem:[%s3725_s19 + $0x70] sm:%s4023_s30]  ;;  %v938_v3 = vld [vmem:[%s3725_s19 + $0xa8] sm:%s4023_s30] }
  0xbc   : > { %937 = vst [vmem:[%s3728_s28 + $0x40] sm:%s4023_s30] %v936_v2  ;;  %939 = vst [vmem:[%s3728_s28 + $0x60] sm:%s4023_s30] %v938_v3 }
  0xbd   : > { %v940_v4 = vld [vmem:[%s3725_s19 + $0xe0] sm:%s4023_s30]  ;;  %v942_v5 = vld [vmem:[%s3725_s19 + $0x118] sm:%s4023_s30] }
  0xbe   : > { %941 = vst [vmem:[%s3728_s28 + $0x80] sm:%s4023_s30] %v940_v4  ;;  %943 = vst [vmem:[%s3728_s28 + $0xa0] sm:%s4023_s30] %v942_v5 }
  0xbf   : > { %v944_v6 = vld [vmem:[%s3725_s19 + $0x150] sm:%s4023_s30]  ;;  %v946_v7 = vld [vmem:[%s3725_s19 + $0x188] sm:%s4023_s30] }
  0xc0   : > { %945 = vst [vmem:[%s3728_s28 + $0xc0] sm:%s4023_s30] %v944_v6  ;;  %947 = vst [vmem:[%s3728_s28 + $0xe0] sm:%s4023_s30] %v946_v7 }
  0xc1   : > { %v948_v8 = vld [vmem:[%s3725_s19 + $0x1c0] sm:%s4023_s30]  ;;  %v950_v9 = vld [vmem:[%s3725_s19 + $0x1f8] sm:%s4023_s30] }
  0xc2   : > { %949 = vst [vmem:[%s3728_s28 + $0x100] sm:%s4023_s30] %v948_v8  ;;  %951 = vst [vmem:[%s3728_s28 + $0x120] sm:%s4023_s30] %v950_v9 }
  0xc3   : > { %v952_v10 = vld [vmem:[%s3725_s19 + $0x230] sm:%s4023_s30]  ;;  %v954_v11 = vld [vmem:[%s3725_s19 + $0x268] sm:%s4023_s30] }
  0xc4   : > { %953 = vst [vmem:[%s3728_s28 + $0x140] sm:%s4023_s30] %v952_v10  ;;  %955 = vst [vmem:[%s3728_s28 + $0x160] sm:%s4023_s30] %v954_v11 }
  0xc5   : > { %v956_v12 = vld [vmem:[%s3725_s19 + $0x2a0] sm:%s4023_s30]  ;;  %v958_v13 = vld [vmem:[%s3725_s19 + $0x2d8] sm:%s4023_s30] }
  0xc6   : > { %957 = vst [vmem:[%s3728_s28 + $0x180] sm:%s4023_s30] %v956_v12  ;;  %959 = vst [vmem:[%s3728_s28 + $0x1a0] sm:%s4023_s30] %v958_v13 }
  0xc7   : > { %v960_v14 = vld [vmem:[%s3725_s19 + $0x310] sm:%s4023_s30]  ;;  %v962_v15 = vld [vmem:[%s3725_s19 + $0x348] sm:%s4023_s30] }
  0xc8   : > { %961 = vst [vmem:[%s3728_s28 + $0x1c0] sm:%s4023_s30] %v960_v14  ;;  %963 = vst [vmem:[%s3728_s28 + $0x1e0] sm:%s4023_s30] %v962_v15 }
  0xc9   : > { %v964_v16 = vld [vmem:[%s3725_s19 + $0x380] sm:%s4023_s30]  ;;  %v966_v17 = vld [vmem:[%s3725_s19 + $0x3b8] sm:%s4023_s30] }
  0xca   : > { %965 = vst [vmem:[%s3728_s28 + $0x200] sm:%s4023_s30] %v964_v16  ;;  %967 = vst [vmem:[%s3728_s28 + $0x220] sm:%s4023_s30] %v966_v17 }
  0xcb   : > { %v968_v18 = vld [vmem:[%s3725_s19 + $0x3f0] sm:%s4023_s30]  ;;  %v970_v19 = vld [vmem:[%s3725_s19 + $0x428] sm:%s4023_s30] }
  0xcc   : > { %969 = vst [vmem:[%s3728_s28 + $0x240] sm:%s4023_s30] %v968_v18  ;;  %971 = vst [vmem:[%s3728_s28 + $0x260] sm:%s4023_s30] %v970_v19 }
  0xcd   : > { %v972_v20 = vld [vmem:[%s3725_s19 + $0x460] sm:%s4023_s30]  ;;  %v974_v21 = vld [vmem:[%s3725_s19 + $0x498] sm:%s4023_s30] }
  0xce   : > { %973 = vst [vmem:[%s3728_s28 + $0x280] sm:%s4023_s30] %v972_v20  ;;  %975 = vst [vmem:[%s3728_s28 + $0x2a0] sm:%s4023_s30] %v974_v21 }
  0xcf   : > { %v976_v22 = vld [vmem:[%s3725_s19 + $0x4d0] sm:%s4023_s30]  ;;  %v978_v23 = vld [vmem:[%s3725_s19 + $0x508] sm:%s4023_s30] }
  0xd0   : > { %977 = vst [vmem:[%s3728_s28 + $0x2c0] sm:%s4023_s30] %v976_v22  ;;  %979 = vst [vmem:[%s3728_s28 + $0x2e0] sm:%s4023_s30] %v978_v23 }
  0xd1   : > { %v980_v24 = vld [vmem:[%s3725_s19 + $0x540] sm:%s4023_s30]  ;;  %v982_v25 = vld [vmem:[%s3725_s19 + $0x578] sm:%s4023_s30] }
  0xd2   : > { %981 = vst [vmem:[%s3728_s28 + $0x300] sm:%s4023_s30] %v980_v24  ;;  %983 = vst [vmem:[%s3728_s28 + $0x320] sm:%s4023_s30] %v982_v25 }
  0xd3   : > { %v984_v26 = vld [vmem:[%s3725_s19 + $0x5b0] sm:%s4023_s30]  ;;  %v986_v27 = vld [vmem:[%s3725_s19 + $0x5e8] sm:%s4023_s30] }
  0xd4   : > { %985 = vst [vmem:[%s3728_s28 + $0x340] sm:%s4023_s30] %v984_v26  ;;  %987 = vst [vmem:[%s3728_s28 + $0x360] sm:%s4023_s30] %v986_v27 }
  0xd5   : > { %v988_v28 = vld [vmem:[%s3725_s19 + $0x620] sm:%s4023_s30]  ;;  %v990_v29 = vld [vmem:[%s3725_s19 + $0x658] sm:%s4023_s30] }
  0xd6   : > { %989 = vst [vmem:[%s3728_s28 + $0x380] sm:%s4023_s30] %v988_v28  ;;  %991 = vst [vmem:[%s3728_s28 + $0x3a0] sm:%s4023_s30] %v990_v29 }
  0xd7   : > { %v992_v30 = vld [vmem:[%s3725_s19 + $0x690] sm:%s4023_s30]  ;;  %v994_v31 = vld [vmem:[%s3725_s19 + $0x6c8] sm:%s4023_s30] }
  0xd8   : > { %993 = vst [vmem:[%s3728_s28 + $0x3c0] sm:%s4023_s30] %v992_v30  ;;  %995 = vst [vmem:[%s3728_s28 + $0x3e0] sm:%s4023_s30] %v994_v31 }
  0xd9 PF: > { %p2679_p2 = scmp.ge.u32.totalorder %s3416_s25, 8 }
  0xda   : > { %s3294_s27 = smov (!%p2679_p2), 1  }
  0xdb   : > { %356 = sbr.rel (%p2679_p2) target bundleno = 256 (0x100), region = 72  ;;  %s357_s29 = sshll.u32 (!%p2679_p2), %s3294_s27, %s3416_s25 }
  0xdc   : > { %s4155_s19 = sadd.s32 (!%p2679_p2), 4294967295, %s357_s29 }
  0xe0   : > { %v367_v32 = vld [vmem:[%s3414_s22] sm:%s4155_s19]  ;;  %v369_v33 = vld [vmem:[%s3414_s22 + $0x38] sm:%s4155_s19] }
  0xe1   : > { %368 = vst [vmem:[%s3418_s26] sm:%s4155_s19] %v367_v32  ;;  %370 = vst [vmem:[%s3418_s26 + $0x20] sm:%s4155_s19] %v369_v33 }
  0xe2   : > { %v371_v34 = vld [vmem:[%s3414_s22 + $0x70] sm:%s4155_s19]  ;;  %v373_v35 = vld [vmem:[%s3414_s22 + $0xa8] sm:%s4155_s19] }
  0xe3   : > { %372 = vst [vmem:[%s3418_s26 + $0x40] sm:%s4155_s19] %v371_v34  ;;  %374 = vst [vmem:[%s3418_s26 + $0x60] sm:%s4155_s19] %v373_v35 }
  0xe4   : > { %v375_v36 = vld [vmem:[%s3414_s22 + $0xe0] sm:%s4155_s19]  ;;  %v377_v37 = vld [vmem:[%s3414_s22 + $0x118] sm:%s4155_s19] }
  0xe5   : > { %376 = vst [vmem:[%s3418_s26 + $0x80] sm:%s4155_s19] %v375_v36  ;;  %378 = vst [vmem:[%s3418_s26 + $0xa0] sm:%s4155_s19] %v377_v37 }
  0xe6   : > { %v379_v38 = vld [vmem:[%s3414_s22 + $0x150] sm:%s4155_s19]  ;;  %v381_v39 = vld [vmem:[%s3414_s22 + $0x188] sm:%s4155_s19] }
  0xe7   : > { %380 = vst [vmem:[%s3418_s26 + $0xc0] sm:%s4155_s19] %v379_v38  ;;  %382 = vst [vmem:[%s3418_s26 + $0xe0] sm:%s4155_s19] %v381_v39 }
  0xe8   : > { %v383_v40 = vld [vmem:[%s3414_s22 + $0x1c0] sm:%s4155_s19]  ;;  %v385_v41 = vld [vmem:[%s3414_s22 + $0x1f8] sm:%s4155_s19] }
  0xe9   : > { %384 = vst [vmem:[%s3418_s26 + $0x100] sm:%s4155_s19] %v383_v40  ;;  %386 = vst [vmem:[%s3418_s26 + $0x120] sm:%s4155_s19] %v385_v41 }
  0xea   : > { %v387_v42 = vld [vmem:[%s3414_s22 + $0x230] sm:%s4155_s19]  ;;  %v389_v43 = vld [vmem:[%s3414_s22 + $0x268] sm:%s4155_s19] }
  0xeb   : > { %388 = vst [vmem:[%s3418_s26 + $0x140] sm:%s4155_s19] %v387_v42  ;;  %390 = vst [vmem:[%s3418_s26 + $0x160] sm:%s4155_s19] %v389_v43 }
  0xec   : > { %v391_v44 = vld [vmem:[%s3414_s22 + $0x2a0] sm:%s4155_s19]  ;;  %v393_v45 = vld [vmem:[%s3414_s22 + $0x2d8] sm:%s4155_s19] }
  0xed   : > { %392 = vst [vmem:[%s3418_s26 + $0x180] sm:%s4155_s19] %v391_v44  ;;  %394 = vst [vmem:[%s3418_s26 + $0x1a0] sm:%s4155_s19] %v393_v45 }
  0xee   : > { %v395_v46 = vld [vmem:[%s3414_s22 + $0x310] sm:%s4155_s19]  ;;  %v397_v47 = vld [vmem:[%s3414_s22 + $0x348] sm:%s4155_s19] }
  0xef   : > { %396 = vst [vmem:[%s3418_s26 + $0x1c0] sm:%s4155_s19] %v395_v46  ;;  %398 = vst [vmem:[%s3418_s26 + $0x1e0] sm:%s4155_s19] %v397_v47 }
  0xf0   : > { %v399_v48 = vld [vmem:[%s3414_s22 + $0x380] sm:%s4155_s19]  ;;  %v401_v49 = vld [vmem:[%s3414_s22 + $0x3b8] sm:%s4155_s19] }
  0xf1   : > { %400 = vst [vmem:[%s3418_s26 + $0x200] sm:%s4155_s19] %v399_v48  ;;  %402 = vst [vmem:[%s3418_s26 + $0x220] sm:%s4155_s19] %v401_v49 }
  0xf2   : > { %v403_v50 = vld [vmem:[%s3414_s22 + $0x3f0] sm:%s4155_s19]  ;;  %v405_v51 = vld [vmem:[%s3414_s22 + $0x428] sm:%s4155_s19] }
  0xf3   : > { %404 = vst [vmem:[%s3418_s26 + $0x240] sm:%s4155_s19] %v403_v50  ;;  %406 = vst [vmem:[%s3418_s26 + $0x260] sm:%s4155_s19] %v405_v51 }
  0xf4   : > { %v407_v52 = vld [vmem:[%s3414_s22 + $0x460] sm:%s4155_s19]  ;;  %v409_v53 = vld [vmem:[%s3414_s22 + $0x498] sm:%s4155_s19] }
  0xf5   : > { %408 = vst [vmem:[%s3418_s26 + $0x280] sm:%s4155_s19] %v407_v52  ;;  %410 = vst [vmem:[%s3418_s26 + $0x2a0] sm:%s4155_s19] %v409_v53 }
  0xf6   : > { %v411_v54 = vld [vmem:[%s3414_s22 + $0x4d0] sm:%s4155_s19]  ;;  %v413_v55 = vld [vmem:[%s3414_s22 + $0x508] sm:%s4155_s19] }
  0xf7   : > { %412 = vst [vmem:[%s3418_s26 + $0x2c0] sm:%s4155_s19] %v411_v54  ;;  %414 = vst [vmem:[%s3418_s26 + $0x2e0] sm:%s4155_s19] %v413_v55 }
  0xf8   : > { %v415_v56 = vld [vmem:[%s3414_s22 + $0x540] sm:%s4155_s19]  ;;  %v417_v57 = vld [vmem:[%s3414_s22 + $0x578] sm:%s4155_s19] }
  0xf9   : > { %416 = vst [vmem:[%s3418_s26 + $0x300] sm:%s4155_s19] %v415_v56  ;;  %418 = vst [vmem:[%s3418_s26 + $0x320] sm:%s4155_s19] %v417_v57 }
  0xfa   : > { %v419_v58 = vld [vmem:[%s3414_s22 + $0x5b0] sm:%s4155_s19]  ;;  %v421_v59 = vld [vmem:[%s3414_s22 + $0x5e8] sm:%s4155_s19] }
  0xfb   : > { %420 = vst [vmem:[%s3418_s26 + $0x340] sm:%s4155_s19] %v419_v58  ;;  %422 = vst [vmem:[%s3418_s26 + $0x360] sm:%s4155_s19] %v421_v59 }
  0xfc   : > { %v423_v60 = vld [vmem:[%s3414_s22 + $0x620] sm:%s4155_s19]  ;;  %v425_v61 = vld [vmem:[%s3414_s22 + $0x658] sm:%s4155_s19] }
  0xfd   : > { %424 = vst [vmem:[%s3418_s26 + $0x380] sm:%s4155_s19] %v423_v60  ;;  %426 = vst [vmem:[%s3418_s26 + $0x3a0] sm:%s4155_s19] %v425_v61 }
  0xfe   : > { %v427_v62 = vld [vmem:[%s3414_s22 + $0x690] sm:%s4155_s19]  ;;  %v429_v63 = vld [vmem:[%s3414_s22 + $0x6c8] sm:%s4155_s19] }
  0xff   : > { %428 = vst [vmem:[%s3418_s26 + $0x3c0] sm:%s4155_s19] %v427_v62  ;;  %430 = vst [vmem:[%s3418_s26 + $0x3e0] sm:%s4155_s19] %v429_v63 }
 0x100 PF: > { %p2681_p3 = scmp.ge.s32.totalorder %s3227_s20, 1  ;;  %p998_p4 = scmp.lt.s32.totalorder %s3227_s20, 3 }
 0x102   : > { %p999_p5 = pnand %p2681_p3, %p998_p4 }
 0x103   : > { %s4288_s25 = sand.u32 (!%p999_p5), 1, %s3219_s18  }
 0x104   : > { %1002 = sbr.rel (%p999_p5) target bundleno = 1520 (0x5f0), region = 126  ;;  %s2682_s22 = sshll.u32 (!%p999_p5), %s4288_s25, 10 }
 0x105   : > { %s4297_s11 = scalar_lea.vmem (!%p999_p5), [#allocation2], %s2682_s22  ;;  %s2683_s16 = sshll.u32 (!%p999_p5), %s4288_s25, 4 }
 0x106   : > { %s1043_s12 = scalar_lea.vmem (!%p999_p5), [#allocation3], %s2683_s16  ;;  %s2482_s17 = scalar_lea.sflag (!%p999_p5), [#allocation4], %s4288_s25 }
 0x109   : > { %v1183_v0 = vld [vmem:[%s4895_s1 + $0x8] sm:$0xff]  ;;  %v3295_v1 = vmov 0   ;;  %v1190_v2 = vld [vmem:[%s4896_s2 + $0x10] sm:$0xf]  ;;  %v1117_v4 = vld [vmem:[%s4297_s11 + $0x1f8] sm:$0xff]  ;;  %vm1415_vm0 = vcmask 1043456  }
 0x10a   : > { %1270 = vmatprep.mubr.f32.mxu0 %v1183_v0  ;;  %1353 = vmatprep.mubr.f32.mxu1 %v1183_v0  ;;  %v1115_v3 = vld [vmem:[%s4297_s11 + $0x1e8] sm:$0xff]  ;;  %v1114_v5 = vld [vmem:[%s4297_s11 + $0x1e0] sm:$0xff]  ;;  %v1116_v6 = vld [vmem:[%s4297_s11 + $0x1f0] sm:$0xff]  ;;  %vm1405_vm1 = vcmask 162816   ;;  %vm2012_vm2 = vcmask 490496   ;;  %s4950_s30 = sld [smem:[#allocation8_spill]] (%p3397_p6) }
 0x10b   : > { %2925 = vset.pattern.permute.xlu0 %v3295_v1  ;;  %2926 = vset.pattern.permute.xlu1 %v3295_v1  ;;  %v1111_v7 = vld [vmem:[%s4297_s11 + $0x1c8] sm:$0xff]  ;;  %v1113_v8 = vld [vmem:[%s4297_s11 + $0x1d8] sm:$0xff]  ;;  %v1110_v9 = vld [vmem:[%s4297_s11 + $0x1c0] sm:$0xff] }
 0x10c   : > { %1203 = vperm.xlu0 %2925, %v1190_v2   ;;  %1206 = vmatprep.subr.mxu0 %v1115_v3  ;;  %v1112_v10 = vld [vmem:[%s4297_s11 + $0x1d0] sm:$0xff]  ;;  %v1107_v11 = vld [vmem:[%s4297_s11 + $0x1a8] sm:$0xff]  ;;  %v1109_v12 = vld [vmem:[%s4297_s11 + $0x1b8] sm:$0xff] }
 0x10d   : > { %1289 = vmatprep.subr.mxu1 %v1117_v4  ;;  %1207 = vmatpush1.msra.mxu0 %v1114_v5  ;;  %v1106_v13 = vld [vmem:[%s4297_s11 + $0x1a0] sm:$0xff]  ;;  %v1108_v14 = vld [vmem:[%s4297_s11 + $0x1b0] sm:$0xff]  ;;  %v1103_v15 = vld [vmem:[%s4297_s11 + $0x188] sm:$0xff] }
 0x10e   : > { %1290 = vmatpush1.msra.mxu1 %v1116_v6  ;;  %1208 = vmatprep.subr.mxu0 %v1111_v7  ;;  %v1105_v16 = vld [vmem:[%s4297_s11 + $0x198] sm:$0xff]  ;;  %v1102_v17 = vld [vmem:[%s4297_s11 + $0x180] sm:$0xff]  ;;  %v1104_v18 = vld [vmem:[%s4297_s11 + $0x190] sm:$0xff] }
 0x10f   : > { %1291 = vmatprep.subr.mxu1 %v1113_v8  ;;  %1209 = vmatpush1.msra.mxu0 %v1110_v9  ;;  %v1099_v19 = vld [vmem:[%s4297_s11 + $0x168] sm:$0xff]  ;;  %v1101_v20 = vld [vmem:[%s4297_s11 + $0x178] sm:$0xff]  ;;  %v1098_v21 = vld [vmem:[%s4297_s11 + $0x160] sm:$0xff] }
 0x110   : > { %1292 = vmatpush1.msra.mxu1 %v1112_v10  ;;  %1210 = vmatprep.subr.mxu0 %v1107_v11  ;;  %v1100_v22 = vld [vmem:[%s4297_s11 + $0x170] sm:$0xff]  ;;  %v1095_v23 = vld [vmem:[%s4297_s11 + $0x148] sm:$0xff]  ;;  %v1097_v24 = vld [vmem:[%s4297_s11 + $0x158] sm:$0xff]  ;;  %s2741_s27 = sshll.u32 (%p3397_p6), %s4950_s30, 2 }
 0x111   : > { %1293 = vmatprep.subr.mxu1 %v1109_v12  ;;  %1211 = vmatpush1.msra.mxu0 %v1106_v13  ;;  %v1094_v25 = vld [vmem:[%s4297_s11 + $0x140] sm:$0xff]  ;;  %v1096_v26 = vld [vmem:[%s4297_s11 + $0x150] sm:$0xff]  ;;  %v1091_v27 = vld [vmem:[%s4297_s11 + $0x128] sm:$0xff]  ;;  %s2490_s29 = ssub.s32 (%p3397_p6), 7, %s2741_s27 }
 0x112   : > { %1294 = vmatpush1.msra.mxu1 %v1108_v14  ;;  %1212 = vmatprep.subr.mxu0 %v1103_v15  ;;  %v1093_v28 = vld [vmem:[%s4297_s11 + $0x138] sm:$0xff]  ;;  %v1090_v29 = vld [vmem:[%s4297_s11 + $0x120] sm:$0xff]  ;;  %v1092_v30 = vld [vmem:[%s4297_s11 + $0x130] sm:$0xff]  ;;  %p2491_p7 = scmp.lt.s32.totalorder (%p3397_p6), %s2490_s29, 4 }
 0x113   : > { %1295 = vmatprep.subr.mxu1 %v1105_v16  ;;  %1213 = vmatpush1.msra.mxu0 %v1102_v17  ;;  %v1087_v31 = vld [vmem:[%s4297_s11 + $0x108] sm:$0xff]  ;;  %v1089_v32 = vld [vmem:[%s4297_s11 + $0x118] sm:$0xff]  ;;  %v1086_v33 = vld [vmem:[%s4297_s11 + $0x100] sm:$0xff] }
 0x114   : > { %1296 = vmatpush1.msra.mxu1 %v1104_v18  ;;  %1214 = vmatprep.subr.mxu0 %v1099_v19  ;;  %v1088_v34 = vld [vmem:[%s4297_s11 + $0x110] sm:$0xff]  ;;  %v1083_v35 = vld [vmem:[%s4297_s11 + $0xe8] sm:$0xff]  ;;  %v1085_v36 = vld [vmem:[%s4297_s11 + $0xf8] sm:$0xff] }
 0x115   : > { %1297 = vmatprep.subr.mxu1 %v1101_v20  ;;  %1215 = vmatpush1.msra.mxu0 %v1098_v21  ;;  %v1082_v37 = vld [vmem:[%s4297_s11 + $0xe0] sm:$0xff]  ;;  %v1084_v38 = vld [vmem:[%s4297_s11 + $0xf0] sm:$0xff]  ;;  %v1079_v39 = vld [vmem:[%s4297_s11 + $0xc8] sm:$0xff] }
 0x116   : > { %1298 = vmatpush1.msra.mxu1 %v1100_v22  ;;  %1216 = vmatprep.subr.mxu0 %v1095_v23  ;;  %v1081_v40 = vld [vmem:[%s4297_s11 + $0xd8] sm:$0xff]  ;;  %v1078_v41 = vld [vmem:[%s4297_s11 + $0xc0] sm:$0xff]  ;;  %v1080_v42 = vld [vmem:[%s4297_s11 + $0xd0] sm:$0xff] }
 0x117   : > { %1299 = vmatprep.subr.mxu1 %v1097_v24  ;;  %1217 = vmatpush1.msra.mxu0 %v1094_v25  ;;  %v1075_v43 = vld [vmem:[%s4297_s11 + $0xa8] sm:$0xff]  ;;  %v1077_v44 = vld [vmem:[%s4297_s11 + $0xb8] sm:$0xff]  ;;  %v1074_v45 = vld [vmem:[%s4297_s11 + $0xa0] sm:$0xff] }
 0x118   : > { %1300 = vmatpush1.msra.mxu1 %v1096_v26  ;;  %1218 = vmatprep.subr.mxu0 %v1091_v27  ;;  %v1076_v46 = vld [vmem:[%s4297_s11 + $0xb0] sm:$0xff]  ;;  %v1071_v47 = vld [vmem:[%s4297_s11 + $0x88] sm:$0xff]  ;;  %v1073_v48 = vld [vmem:[%s4297_s11 + $0x98] sm:$0xff] }
 0x119   : > { %1301 = vmatprep.subr.mxu1 %v1093_v28  ;;  %1219 = vmatpush1.msra.mxu0 %v1090_v29  ;;  %v1070_v49 = vld [vmem:[%s4297_s11 + $0x80] sm:$0xff]  ;;  %v1072_v50 = vld [vmem:[%s4297_s11 + $0x90] sm:$0xff]  ;;  %v1067_v51 = vld [vmem:[%s4297_s11 + $0x68] sm:$0xff] }
 0x11a   : > { %1302 = vmatpush1.msra.mxu1 %v1092_v30  ;;  %1220 = vmatprep.subr.mxu0 %v1087_v31  ;;  %v1069_v52 = vld [vmem:[%s4297_s11 + $0x78] sm:$0xff]  ;;  %v1066_v53 = vld [vmem:[%s4297_s11 + $0x60] sm:$0xff]  ;;  %v1068_v54 = vld [vmem:[%s4297_s11 + $0x70] sm:$0xff] }
 0x11b   : > { %1303 = vmatprep.subr.mxu1 %v1089_v32  ;;  %1221 = vmatpush1.msra.mxu0 %v1086_v33  ;;  %v1063_v55 = vld [vmem:[%s4297_s11 + $0x48] sm:$0xff]  ;;  %v1065_v56 = vld [vmem:[%s4297_s11 + $0x58] sm:$0xff]  ;;  %v1062_v57 = vld [vmem:[%s4297_s11 + $0x40] sm:$0xff] }
 0x11c   : > { %1304 = vmatpush1.msra.mxu1 %v1088_v34  ;;  %1222 = vmatprep.subr.mxu0 %v1083_v35  ;;  %v1064_v58 = vld [vmem:[%s4297_s11 + $0x50] sm:$0xff]  ;;  %v1059_v59 = vld [vmem:[%s4297_s11 + $0x28] sm:$0xff]  ;;  %v1061_v60 = vld [vmem:[%s4297_s11 + $0x38] sm:$0xff] }
 0x11d   : > { %1305 = vmatprep.subr.mxu1 %v1085_v36  ;;  %1223 = vmatpush1.msra.mxu0 %v1082_v37  ;;  %v1058_v61 = vld [vmem:[%s4297_s11 + $0x20] sm:$0xff]  ;;  %v1060_v62 = vld [vmem:[%s4297_s11 + $0x30] sm:$0xff]  ;;  %v1055_v63 = vld [vmem:[%s4297_s11 + $0x8] sm:$0xff] }
 0x11e   : > { %1306 = vmatpush1.msra.mxu1 %v1084_v38  ;;  %1224 = vmatprep.subr.mxu0 %v1079_v39  ;;  %v1057_v0 = vld [vmem:[%s4297_s11 + $0x18] sm:$0xff]  ;;  %v1054_v1 = vld [vmem:[%s4297_s11] sm:$0xff]  ;;  %v1056_v2 = vld [vmem:[%s4297_s11 + $0x10] sm:$0xff] }
 0x11f   : > { %1307 = vmatprep.subr.mxu1 %v1081_v40  ;;  %1225 = vmatpush1.msra.mxu0 %v1078_v41  ;;  %v1179_v3 = vld [vmem:[%s4297_s11 + $0x3e8] sm:$0xff]  ;;  %v1181_v4 = vld [vmem:[%s4297_s11 + $0x3f8] sm:$0xff]  ;;  %v1178_v5 = vld [vmem:[%s4297_s11 + $0x3e0] sm:$0xff] }
 0x120   : > { %1308 = vmatpush1.msra.mxu1 %v1080_v42  ;;  %1226 = vmatprep.subr.mxu0 %v1075_v43  ;;  %v1180_v6 = vld [vmem:[%s4297_s11 + $0x3f0] sm:$0xff]  ;;  %v1175_v7 = vld [vmem:[%s4297_s11 + $0x3c8] sm:$0xff]  ;;  %v1177_v8 = vld [vmem:[%s4297_s11 + $0x3d8] sm:$0xff] }
 0x121   : > { %1309 = vmatprep.subr.mxu1 %v1077_v44  ;;  %1227 = vmatpush1.msra.mxu0 %v1074_v45  ;;  %v1174_v9 = vld [vmem:[%s4297_s11 + $0x3c0] sm:$0xff]  ;;  %v1176_v10 = vld [vmem:[%s4297_s11 + $0x3d0] sm:$0xff]  ;;  %v1171_v11 = vld [vmem:[%s4297_s11 + $0x3a8] sm:$0xff] }
 0x122   : > { %1310 = vmatpush1.msra.mxu1 %v1076_v46  ;;  %1228 = vmatprep.subr.mxu0 %v1071_v47  ;;  %v1173_v12 = vld [vmem:[%s4297_s11 + $0x3b8] sm:$0xff]  ;;  %v1170_v13 = vld [vmem:[%s4297_s11 + $0x3a0] sm:$0xff]  ;;  %v1172_v14 = vld [vmem:[%s4297_s11 + $0x3b0] sm:$0xff] }
 0x123   : > { %1311 = vmatprep.subr.mxu1 %v1073_v48  ;;  %1229 = vmatpush1.msra.mxu0 %v1070_v49  ;;  %v1167_v15 = vld [vmem:[%s4297_s11 + $0x388] sm:$0xff]  ;;  %v1169_v16 = vld [vmem:[%s4297_s11 + $0x398] sm:$0xff]  ;;  %v1166_v17 = vld [vmem:[%s4297_s11 + $0x380] sm:$0xff] }
 0x124   : > { %1312 = vmatpush1.msra.mxu1 %v1072_v50  ;;  %1230 = vmatprep.subr.mxu0 %v1067_v51  ;;  %v1168_v18 = vld [vmem:[%s4297_s11 + $0x390] sm:$0xff]  ;;  %v1163_v19 = vld [vmem:[%s4297_s11 + $0x368] sm:$0xff]  ;;  %v1165_v20 = vld [vmem:[%s4297_s11 + $0x378] sm:$0xff] }
 0x125   : > { %1313 = vmatprep.subr.mxu1 %v1069_v52  ;;  %1231 = vmatpush1.msra.mxu0 %v1066_v53  ;;  %v1162_v21 = vld [vmem:[%s4297_s11 + $0x360] sm:$0xff]  ;;  %v1164_v22 = vld [vmem:[%s4297_s11 + $0x370] sm:$0xff]  ;;  %v1159_v23 = vld [vmem:[%s4297_s11 + $0x348] sm:$0xff] }
 0x126   : > { %1314 = vmatpush1.msra.mxu1 %v1068_v54  ;;  %1232 = vmatprep.subr.mxu0 %v1063_v55  ;;  %v1161_v24 = vld [vmem:[%s4297_s11 + $0x358] sm:$0xff]  ;;  %v1158_v25 = vld [vmem:[%s4297_s11 + $0x340] sm:$0xff]  ;;  %v1160_v26 = vld [vmem:[%s4297_s11 + $0x350] sm:$0xff] }
 0x127   : > { %1315 = vmatprep.subr.mxu1 %v1065_v56  ;;  %1233 = vmatpush1.msra.mxu0 %v1062_v57  ;;  %v1155_v27 = vld [vmem:[%s4297_s11 + $0x328] sm:$0xff]  ;;  %v1157_v28 = vld [vmem:[%s4297_s11 + $0x338] sm:$0xff]  ;;  %v1154_v29 = vld [vmem:[%s4297_s11 + $0x320] sm:$0xff] }
 0x128   : > { %1316 = vmatpush1.msra.mxu1 %v1064_v58  ;;  %1234 = vmatprep.subr.mxu0 %v1059_v59  ;;  %v1156_v30 = vld [vmem:[%s4297_s11 + $0x330] sm:$0xff]  ;;  %v1151_v31 = vld [vmem:[%s4297_s11 + $0x308] sm:$0xff]  ;;  %v1153_v32 = vld [vmem:[%s4297_s11 + $0x318] sm:$0xff] }
 0x129   : > { %1317 = vmatprep.subr.mxu1 %v1061_v60  ;;  %1235 = vmatpush1.msra.mxu0 %v1058_v61  ;;  %v1150_v33 = vld [vmem:[%s4297_s11 + $0x300] sm:$0xff]  ;;  %v1152_v34 = vld [vmem:[%s4297_s11 + $0x310] sm:$0xff]  ;;  %v1147_v35 = vld [vmem:[%s4297_s11 + $0x2e8] sm:$0xff] }
 0x12a   : > { %1318 = vmatpush1.msra.mxu1 %v1060_v62  ;;  %1236 = vmatprep.subr.mxu0 %v1055_v63  ;;  %v1149_v36 = vld [vmem:[%s4297_s11 + $0x2f8] sm:$0xff]  ;;  %v1146_v37 = vld [vmem:[%s4297_s11 + $0x2e0] sm:$0xff]  ;;  %v1148_v38 = vld [vmem:[%s4297_s11 + $0x2f0] sm:$0xff] }
 0x12b   : > { %1319 = vmatprep.subr.mxu1 %v1057_v0  ;;  %1237 = vmatpush1.msra.mxu0 %v1054_v1  ;;  %v1143_v39 = vld [vmem:[%s4297_s11 + $0x2c8] sm:$0xff]  ;;  %v1145_v40 = vld [vmem:[%s4297_s11 + $0x2d8] sm:$0xff]  ;;  %v1142_v41 = vld [vmem:[%s4297_s11 + $0x2c0] sm:$0xff] }
 0x12c   : > { %1320 = vmatpush1.msra.mxu1 %v1056_v2  ;;  %1238 = vmatprep.subr.mxu0 %v1179_v3  ;;  %v1144_v42 = vld [vmem:[%s4297_s11 + $0x2d0] sm:$0xff]  ;;  %v1139_v43 = vld [vmem:[%s4297_s11 + $0x2a8] sm:$0xff]  ;;  %v1141_v44 = vld [vmem:[%s4297_s11 + $0x2b8] sm:$0xff] }
 0x12d   : > { %1321 = vmatprep.subr.mxu1 %v1181_v4  ;;  %1239 = vmatpush2.msra.mxu0 %v1178_v5  ;;  %v1138_v45 = vld [vmem:[%s4297_s11 + $0x2a0] sm:$0xff]  ;;  %v1140_v46 = vld [vmem:[%s4297_s11 + $0x2b0] sm:$0xff]  ;;  %v1135_v47 = vld [vmem:[%s4297_s11 + $0x288] sm:$0xff] }
 0x12e   : > { %1322 = vmatpush2.msra.mxu1 %v1180_v6  ;;  %1240 = vmatprep.subr.mxu0 %v1175_v7  ;;  %v1137_v48 = vld [vmem:[%s4297_s11 + $0x298] sm:$0xff]  ;;  %v1134_v49 = vld [vmem:[%s4297_s11 + $0x280] sm:$0xff]  ;;  %v1136_v50 = vld [vmem:[%s4297_s11 + $0x290] sm:$0xff] }
 0x12f   : > { %1323 = vmatprep.subr.mxu1 %v1177_v8  ;;  %1241 = vmatpush2.msra.mxu0 %v1174_v9  ;;  %v1131_v51 = vld [vmem:[%s4297_s11 + $0x268] sm:$0xff]  ;;  %v1133_v52 = vld [vmem:[%s4297_s11 + $0x278] sm:$0xff]  ;;  %v1130_v53 = vld [vmem:[%s4297_s11 + $0x260] sm:$0xff] }
 0x130   : > { %1324 = vmatpush2.msra.mxu1 %v1176_v10  ;;  %1242 = vmatprep.subr.mxu0 %v1171_v11  ;;  %v1132_v54 = vld [vmem:[%s4297_s11 + $0x270] sm:$0xff]  ;;  %v1127_v55 = vld [vmem:[%s4297_s11 + $0x248] sm:$0xff]  ;;  %v1129_v56 = vld [vmem:[%s4297_s11 + $0x258] sm:$0xff] }
 0x131   : > { %1325 = vmatprep.subr.mxu1 %v1173_v12  ;;  %1243 = vmatpush2.msra.mxu0 %v1170_v13  ;;  %v1126_v57 = vld [vmem:[%s4297_s11 + $0x240] sm:$0xff]  ;;  %v1128_v58 = vld [vmem:[%s4297_s11 + $0x250] sm:$0xff]  ;;  %v1123_v59 = vld [vmem:[%s4297_s11 + $0x228] sm:$0xff] }
 0x132   : > { %1326 = vmatpush2.msra.mxu1 %v1172_v14  ;;  %1244 = vmatprep.subr.mxu0 %v1167_v15  ;;  %v1125_v60 = vld [vmem:[%s4297_s11 + $0x238] sm:$0xff]  ;;  %v1122_v61 = vld [vmem:[%s4297_s11 + $0x220] sm:$0xff]  ;;  %v1124_v62 = vld [vmem:[%s4297_s11 + $0x230] sm:$0xff] }
 0x133   : > { %1327 = vmatprep.subr.mxu1 %v1169_v16  ;;  %1245 = vmatpush2.msra.mxu0 %v1166_v17  ;;  %v1119_v63 = vld [vmem:[%s4297_s11 + $0x208] sm:$0xff]  ;;  %v1121_v0 = vld [vmem:[%s4297_s11 + $0x218] sm:$0xff]  ;;  %v1118_v1 = vld [vmem:[%s4297_s11 + $0x200] sm:$0xff] }
 0x134   : > { %1328 = vmatpush2.msra.mxu1 %v1168_v18  ;;  %1246 = vmatprep.subr.mxu0 %v1163_v19  ;;  %v1120_v2 = vld [vmem:[%s4297_s11 + $0x210] sm:$0xff]  ;;  %v1182_v3 = vld [vmem:[%s4895_s1] sm:$0xff]  ;;  %v1185_v4 = vld [vmem:[%s4895_s1 + $0x18] sm:$0xff] }
 0x135   : > { %1329 = vmatprep.subr.mxu1 %v1165_v20  ;;  %1247 = vmatpush2.msra.mxu0 %v1162_v21  ;;  %v1189_v5 = vld [vmem:[%s4896_s2 + $0x8] sm:$0xff]  ;;  %v1188_v6 = vld [vmem:[%s4896_s2] sm:$0xff]  ;;  %v1184_v7 = vld [vmem:[%s4895_s1 + $0x10] sm:$0xff] }
 0x136   : > { %1330 = vmatpush2.msra.mxu1 %v1164_v22  ;;  %1248 = vmatprep.subr.mxu0 %v1159_v23  ;;  %v1187_v8 = vld [vmem:[%s4895_s1 + $0x28] sm:$0xf]  ;;  %v1389_v10 = vld [vmem:[%s4898_s4 + $0x10] sm:$0xf]  ;;  %v1186_v11 = vld [vmem:[%s4895_s1 + $0x20] sm:$0xf] }
 0x137   : > { %1331 = vmatprep.subr.mxu1 %v1161_v24  ;;  %1249 = vmatpush2.msra.mxu0 %v1158_v25  ;;  %v1388_v9 = vld [vmem:[%s4898_s4 + $0x8] sm:$0xff]  ;;  %v1621_v12 = vld [vmem:[%s4900_s6 + $0x38] sm:$0xf]  ;;  %v1387_v13 = vld [vmem:[%s4898_s4] sm:$0xff] }
 0x138   : > { %1332 = vmatpush2.msra.mxu1 %v1160_v26  ;;  %1250 = vmatprep.subr.mxu0 %v1155_v27  ;;  %v1619_v14 = vld [vmem:[%s4900_s6 + $0x28] sm:$0xff]  ;;  %v1620_v15 = vld [vmem:[%s4900_s6 + $0x30] sm:$0xff]  ;;  %v1617_v16 = vld [vmem:[%s4900_s6 + $0x18] sm:$0xff] }
 0x139   : > { %1333 = vmatprep.subr.mxu1 %v1157_v28  ;;  %1251 = vmatpush2.msra.mxu0 %v1154_v29  ;;  %v1618_v17 = vld [vmem:[%s4900_s6 + $0x20] sm:$0xff]  ;;  %v1615_v18 = vld [vmem:[%s4900_s6 + $0x8] sm:$0xff]  ;;  %v1616_v19 = vld [vmem:[%s4900_s6 + $0x10] sm:$0xff] }
 0x13a   : > { %1334 = vmatpush2.msra.mxu1 %v1156_v30  ;;  %1252 = vmatprep.subr.mxu0 %v1151_v31  ;;  %v1971_v20 = vld [vmem:[%s4902_s8 + $0x38] sm:$0xf]  ;;  %v1614_v21 = vld [vmem:[%s4900_s6] sm:$0xff]  ;;  %v1969_v22 = vld [vmem:[%s4902_s8 + $0x28] sm:$0xff]  ;;  %v3296_v30 = vmov 0.0  }
 0x13b   : > { %1335 = vmatprep.subr.mxu1 %v1153_v32  ;;  %1253 = vmatpush2.msra.mxu0 %v1150_v33  ;;  %v1970_v23 = vld [vmem:[%s4902_s8 + $0x30] sm:$0xff]  ;;  %v1967_v24 = vld [vmem:[%s4902_s8 + $0x18] sm:$0xff]  ;;  %v1968_v25 = vld [vmem:[%s4902_s8 + $0x20] sm:$0xff] }
 0x13c   : > { %1336 = vmatpush2.msra.mxu1 %v1152_v34  ;;  %1254 = vmatprep.subr.mxu0 %v1147_v35  ;;  %v1965_v26 = vld [vmem:[%s4902_s8 + $0x8] sm:$0xff]  ;;  %v1966_v27 = vld [vmem:[%s4902_s8 + $0x10] sm:$0xff]  ;;  %v2308_v28 = vld [vmem:[%s4904_s10] sm:$0x7] }
 0x13d   : > { %1337 = vmatprep.subr.mxu1 %v1149_v36  ;;  %1255 = vmatpush2.msra.mxu0 %v1146_v37  ;;  %v1964_v29 = vld [vmem:[%s4902_s8] sm:$0xff] }
 0x13e   : > { %1338 = vmatpush2.msra.mxu1 %v1148_v38  ;;  %1256 = vmatprep.subr.mxu0 %v1143_v39 }
 0x13f   : > { %1339 = vmatprep.subr.mxu1 %v1145_v40  ;;  %1257 = vmatpush2.msra.mxu0 %v1142_v41 }
 0x140   : > { %1340 = vmatpush2.msra.mxu1 %v1144_v42  ;;  %1258 = vmatprep.subr.mxu0 %v1139_v43 }
 0x141   : > { %1341 = vmatprep.subr.mxu1 %v1141_v44  ;;  %1259 = vmatpush2.msra.mxu0 %v1138_v45 }
 0x142   : > { %1342 = vmatpush2.msra.mxu1 %v1140_v46  ;;  %1260 = vmatprep.subr.mxu0 %v1135_v47 }
 0x143   : > { %1343 = vmatprep.subr.mxu1 %v1137_v48  ;;  %1261 = vmatpush2.msra.mxu0 %v1134_v49 }
 0x144   : > { %1344 = vmatpush2.msra.mxu1 %v1136_v50  ;;  %1262 = vmatprep.subr.mxu0 %v1131_v51 }
 0x145   : > { %1345 = vmatprep.subr.mxu1 %v1133_v52  ;;  %1263 = vmatpush2.msra.mxu0 %v1130_v53 }
 0x146   : > { %1346 = vmatpush2.msra.mxu1 %v1132_v54  ;;  %1264 = vmatprep.subr.mxu0 %v1127_v55 }
 0x147   : > { %1347 = vmatprep.subr.mxu1 %v1129_v56  ;;  %1265 = vmatpush2.msra.mxu0 %v1126_v57 }
 0x148   : > { %1348 = vmatpush2.msra.mxu1 %v1128_v58  ;;  %1266 = vmatprep.subr.mxu0 %v1123_v59 }
 0x149   : > { %1349 = vmatprep.subr.mxu1 %v1125_v60  ;;  %1267 = vmatpush2.msra.mxu0 %v1122_v61 }
 0x14a   : > { %1350 = vmatpush2.msra.mxu1 %v1124_v62  ;;  %1268 = vmatprep.subr.mxu0 %v1119_v63 }
 0x14b   : > { %1351 = vmatprep.subr.mxu1 %v1121_v0  ;;  %1269 = vmatpush2.msra.mxu0 %v1118_v1 }
 0x14c   : > { %1352 = vmatpush2.msra.mxu1 %v1120_v2  ;;  %1271 = vmatmul.mubr.f32.vlgmr.msra.gmra.mxu0 %v1182_v3 }
 0x14d   : > { %1354 = vmatmul.mubr.f32.vlgmr.msra.gmra.mxu1 %v1182_v3  ;;  %1276 = vmatprep.mubr.f32.mxu0 %v1185_v4 }
 0x14e   : > { %1359 = vmatprep.mubr.f32.mxu1 %v1185_v4  ;;  %1198 = vperm.xlu0 %2925, %v1189_v5   ;;  %v1384_v4 = vld [vmem:[%s4897_s3] sm:$0xff] }
 0x14f   : > { %1193 = vperm.xlu1 %2926, %v1188_v6  }
 0x150   : > { %1277 = vmatmul.mubr.f32.gmra.mxu0 %v1184_v7 }
 0x151   : > { %1360 = vmatmul.mubr.f32.gmra.mxu1 %v1184_v7  ;;  %1282 = vmatprep.mubr.f32.mxu0 %v1187_v8  ;;  %v1385_v7 = vld [vmem:[%s4897_s3 + $0x8] sm:$0xff] }
 0x152   : > { %1365 = vmatprep.mubr.f32.mxu1 %v1187_v8  ;;  %1397 = vperm.xlu0 %2925, %v1388_v9   ;;  %v1386_v8 = vld [vmem:[%s4897_s3 + $0x10] sm:$0xf] }
 0x153   : > { %1402 = vperm.xlu1 %2926, %v1389_v10  }
 0x154   : > { %1283 = vmatmul.mubr.f32.gmra.mxu0 %v1186_v11 }
 0x155   : > { %1366 = vmatmul.mubr.f32.gmra.mxu1 %v1186_v11  ;;  %1492 = vmatprep.mubr.f32.mxu0 %v3296_v30 }
 0x156   : > { %1659 = vperm.xlu0 %2925, %v1621_v12   ;;  %1575 = vmatprep.mubr.f32.mxu1 %v3296_v30 }
 0x157   : > { %1392 = vperm.xlu1 %2926, %v1387_v13  }
 0x15a   : > { %1649 = vperm.xlu0 %2925, %v1619_v14  }
 0x15b   : > { %1654 = vperm.xlu1 %2926, %v1620_v15  }
 0x15e   : > { %1639 = vperm.xlu0 %2925, %v1617_v16  }
 0x15f   : > { %1644 = vperm.xlu1 %2926, %v1618_v17  }
 0x162   : > { %1629 = vperm.xlu0 %2925, %v1615_v18  }
 0x163   : > { %1634 = vperm.xlu1 %2926, %v1616_v19  }
 0x166   : > { %2009 = vperm.xlu0 %2925, %v1971_v20  }
 0x167   : > { %1624 = vperm.xlu1 %2926, %v1614_v21  }
 0x16a   : > { %1999 = vperm.xlu0 %2925, %v1969_v22  }
 0x16b   : > { %2004 = vperm.xlu1 %2926, %v1970_v23  }
 0x16e   : > { %1989 = vperm.xlu0 %2925, %v1967_v24  }
 0x16f   : > { %1994 = vperm.xlu1 %2926, %v1968_v25  }
 0x172   : > { %1979 = vperm.xlu0 %2925, %v1965_v26  }
 0x173   : > { %1984 = vperm.xlu1 %2926, %v1966_v27  }
 0x176   : > { %2311 = vperm.xlu0 %2925, %v2308_v28  }
 0x177   : > { %1974 = vperm.xlu1 %2926, %v1964_v29  }
 0x187   : > { %v1204_v31 = vpop.permute.xlu0 %1203 }
 0x1c9   : > { %v1199_v40 = vpop.permute.xlu0 %1198 }
 0x1ca   : > { %v1194_v36 = vpop.permute.xlu1 %1193 }
 0x1cd   : > { %v1398_v17 = vpop.permute.xlu0 %1397 }
 0x1ce   : > { %v1403_v9 = vpop.permute.xlu1 %1402 }
 0x1d2   : > { %v1393_v13 = vpop.permute.xlu1 %1392 }
 0x20c   : > { %v1272_v32 = vpop.f32.mrf.mxu0 }
 0x20d   : > { %v1355_v33 = vpop.f32.mrf.mxu1  ;;  %v1273_v37 = vadd.f32 %v1272_v32, %v1194_v36 }
 0x20e   : > { %v1274_v34 = vpop.f32.mrf.mxu0  ;;  %v1356_v57 = vadd.f32 %v1355_v33, %v1194_v36 }
 0x20f   : > { %v1357_v35 = vpop.f32.mrf.mxu1  ;;  %v1275_v41 = vadd.f32 %v1274_v34, %v1194_v36  ;;  %2927 = vtanh.f32 %v1273_v37 }
 0x210   : > { %v1278_v38 = vpop.f32.mrf.mxu0  ;;  %v1358_v56 = vadd.f32 %v1357_v35, %v1194_v36 }
 0x211   : > { %v1361_v39 = vpop.f32.mrf.mxu1  ;;  %v1279_v42 = vadd.f32 %v1278_v38, %v1199_v40  ;;  %2929 = vtanh.f32 %v1275_v41 }
 0x212   : > { %v1280_v43 = vpop.f32.mrf.mxu0  ;;  %v1362_v55 = vadd.f32 %v1361_v39, %v1199_v40 }
 0x213   : > { %v1363_v44 = vpop.f32.mrf.mxu1  ;;  %v1281_v45 = vadd.f32 %v1280_v43, %v1199_v40  ;;  %2931 = vtanh.f32 %v1279_v42 }
 0x214   : > { %v1284_v46 = vpop.f32.mrf.mxu0  ;;  %v1364_v54 = vadd.f32 %v1363_v44, %v1199_v40 }
 0x215   : > { %v1367_v47 = vpop.f32.mrf.mxu1  ;;  %v1285_v48 = vadd.f32 %v1284_v46, %v1204_v31  ;;  %2933 = vtanh.f32 %v1281_v45 }
 0x216   : > { %v1286_v49 = vpop.f32.mrf.mxu0  ;;  %v1368_v51 = vadd.f32 %v1367_v47, %v1204_v31  ;;  %v1606_v47 = vld [vmem:[%s4899_s5] sm:$0xff] }
 0x217   : > { %v1369_v50 = vpop.f32.mrf.mxu1  ;;  %v1287_v52 = vadd.f32 %v1286_v49, %v1204_v31  ;;  %2935 = vtanh.f32 %v1285_v48 }
 0x218   : > { %v1370_v53 = vadd.f32 %v1369_v50, %v1204_v31  ;;  %v1607_v50 = vld [vmem:[%s4899_s5 + $0x8] sm:$0xff] }
 0x219   : > { %2937 = vtanh.f32 %v1287_v52  ;;  %v1609_v52 = vld [vmem:[%s4899_s5 + $0x18] sm:$0xff] }
 0x21a   : > { %2939 = vtanh.f32 %v1370_v53  ;;  %v1610_v53 = vld [vmem:[%s4899_s5 + $0x20] sm:$0xff] }
 0x21b   : > { %2941 = vtanh.f32 %v1368_v51  ;;  %v1608_v51 = vld [vmem:[%s4899_s5 + $0x10] sm:$0xff] }
 0x21c   : > { %2943 = vtanh.f32 %v1364_v54  ;;  %v2928_v58 = vpop.eup %2927  ;;  %v1611_v54 = vld [vmem:[%s4899_s5 + $0x28] sm:$0xff] }
 0x21d   : > { %2945 = vtanh.f32 %v1362_v55  ;;  %v1612_v55 = vld [vmem:[%s4899_s5 + $0x30] sm:$0xff] }
 0x21e   : > { %2947 = vtanh.f32 %v1358_v56  ;;  %v2930_v59 = vpop.eup %2929  ;;  %v1613_v56 = vld [vmem:[%s4899_s5 + $0x38] sm:$0xf] }
 0x21f   : > { %2949 = vtanh.f32 %v1356_v57  ;;  %v4595_v57 = vpop.permute.xlu1 %1654 }
 0x220   : > { %v2932_v60 = vpop.eup %2931 }
 0x222   : > { %v2934_v61 = vpop.eup %2933 }
 0x224   : > { %v2936_v62 = vpop.eup %2935 }
 0x226   : > { %v2938_v63 = vpop.eup %2937 }
 0x227   : > { %v2940_v0 = vpop.eup %2939  ;;  %2684 = vmatprep.subr.msk.mxu0 %vm1415_vm0, %v2938_v63 }
 0x228   : > { %v2942_v1 = vpop.eup %2941  ;;  %2689 = vmatprep.subr.msk.mxu1 %vm1415_vm0, %v2940_v0  ;;  %2685 = vmatpush1.msk.msra.mxu0 %vm1415_vm0, %v2936_v62 }
 0x229   : > { %v2944_v2 = vpop.eup %2943  ;;  %2690 = vmatpush1.msk.msra.mxu1 %vm1415_vm0, %v2942_v1  ;;  %1456 = vmatprep.subr.mxu0 %v2934_v61 }
 0x22a   : > { %v2946_v3 = vpop.eup %2945  ;;  %1539 = vmatprep.subr.mxu1 %v2944_v2  ;;  %1457 = vmatpush1.msra.mxu0 %v2932_v60  ;;  %v4599_v60 = vpop.permute.xlu1 %1644 }
 0x22b   : > { %v2948_v5 = vpop.eup %2947  ;;  %1540 = vmatpush1.msra.mxu1 %v2946_v3  ;;  %1458 = vmatprep.subr.mxu0 %v2930_v59 }
 0x22c   : > { %v2950_v6 = vpop.eup %2949  ;;  %1541 = vmatprep.subr.mxu1 %v2948_v5  ;;  %1459 = vmatpush1.msra.mxu0 %v2928_v58  ;;  %v4597_v58 = vpop.permute.xlu0 %1659 }
 0x22d   : > { %1542 = vmatpush1.msra.mxu1 %v2950_v6  ;;  %2686 = vmatmul.mubr.msk.f32.vlgmr.msra.gmra.mxu0 %vm1405_vm1, %v1384_v4 }
 0x22e   : > { %2691 = vmatmul.mubr.msk.f32.vlgmr.msra.gmra.mxu1 %vm1405_vm1, %v1384_v4  ;;  %1498 = vmatprep.mubr.f32.mxu0 %v3296_v30  ;;  %v4609_v4 = vpop.permute.xlu1 %1634 }
 0x22f   : > { %1581 = vmatprep.mubr.f32.mxu1 %v3296_v30 }
 0x230   : > { %v4603_v63 = vpop.permute.xlu0 %1649 }
 0x231   : > { %2687 = vmatmul.mubr.msk.f32.gmra.mxu0 %vm1405_vm1, %v1385_v7 }
 0x232   : > { %2692 = vmatmul.mubr.msk.f32.gmra.mxu1 %vm1405_vm1, %v1385_v7  ;;  %1504 = vmatprep.mubr.f32.mxu0 %v3296_v30 }
 0x233   : > { %1587 = vmatprep.mubr.f32.mxu1 %v3296_v30 }
 0x234   : > { %v4613_v7 = vpop.permute.xlu0 %1639 }
 0x235   : > { %2688 = vmatmul.mubr.msk.f32.gmra.mxu0 %vm1405_vm1, %v1386_v8 }
 0x236   : > { %2693 = vmatmul.mubr.msk.f32.gmra.mxu1 %vm1405_vm1, %v1386_v8  ;;  %1762 = vmatprep.mubr.f32.mxu0 %v3296_v30 }
 0x237   : > { %1875 = vmatprep.mubr.f32.mxu1 %v3296_v30 }
 0x2ed   : > { %v1494_v10 = vpop.f32.mrf.mxu0 }
 0x2ee   : > { %v1577_v11 = vpop.f32.mrf.mxu1  ;;  %v1495_v15 = vadd.f32 %v1494_v10, %v1393_v13 }
 0x2ef   : > { %v1496_v12 = vpop.f32.mrf.mxu0  ;;  %v1578_v36 = vadd.f32 %v1577_v11, %v1393_v13 }
 0x2f0   : > { %v1579_v14 = vpop.f32.mrf.mxu1  ;;  %v1497_v18 = vadd.f32 %v1496_v12, %v1393_v13  ;;  %2951 = vtanh.f32 %v1495_v15  ;;  %v4619_v12 = vpop.permute.xlu1 %1624 }
 0x2f1   : > { %v1500_v16 = vpop.f32.mrf.mxu0  ;;  %v1580_v35 = vadd.f32 %v1579_v14, %v1393_v13 }
 0x2f2   : > { %v1583_v19 = vpop.f32.mrf.mxu1  ;;  %v1501_v20 = vadd.f32 %v1500_v16, %v1398_v17  ;;  %2953 = vtanh.f32 %v1497_v18  ;;  %v4624_v16 = vpop.permute.xlu0 %1629 }
 0x2f3   : > { %v1502_v21 = vpop.f32.mrf.mxu0  ;;  %v1584_v34 = vadd.f32 %v1583_v19, %v1398_v17 }
 0x2f4   : > { %v1503_v22 = vadd.f32 %v1502_v21, %v1398_v17  ;;  %v1585_v23 = vpop.f32.mrf.mxu1  ;;  %2955 = vtanh.f32 %v1501_v20 }
 0x2f5   : > { %v1506_v24 = vpop.f32.mrf.mxu0  ;;  %v1586_v32 = vadd.f32 %v1585_v23, %v1398_v17 }
 0x2f6   : > { %v1507_v25 = vadd.f32 %v1506_v24, %v1403_v9  ;;  %v1589_v26 = vpop.f32.mrf.mxu1  ;;  %2957 = vtanh.f32 %v1503_v22 }
 0x2f7   : > { %v1508_v27 = vpop.f32.mrf.mxu0  ;;  %v1590_v28 = vadd.f32 %v1589_v26, %v1403_v9 }
 0x2f8   : > { %v1509_v29 = vadd.f32 %v1508_v27, %v1403_v9  ;;  %v1591_v31 = vpop.f32.mrf.mxu1  ;;  %2959 = vtanh.f32 %v1507_v25 }
 0x2f9   : > { %v1592_v33 = vadd.f32 %v1591_v31, %v1403_v9 }
 0x2fa   : > { %2961 = vtanh.f32 %v1509_v29 }
 0x2fb   : > { %2963 = vtanh.f32 %v1592_v33 }
 0x2fc   : > { %2965 = vtanh.f32 %v1590_v28 }
 0x2fd   : > { %2967 = vtanh.f32 %v1586_v32  ;;  %v2952_v37 = vpop.eup %2951 }
 0x2fe   : > { %2969 = vtanh.f32 %v1584_v34 }
 0x2ff   : > { %2971 = vtanh.f32 %v1580_v35  ;;  %v2954_v38 = vpop.eup %2953 }
 0x300   : > { %2973 = vtanh.f32 %v1578_v36 }
 0x301   : > { %v2956_v39 = vpop.eup %2955 }
 0x303   : > { %v2958_v40 = vpop.eup %2957 }
 0x305   : > { %v2960_v41 = vpop.eup %2959 }
 0x307   : > { %v2962_v42 = vpop.eup %2961 }
 0x308   : > { %v2964_v43 = vpop.eup %2963  ;;  %2694 = vmatprep.subr.msk.mxu0 %vm1415_vm0, %v2962_v42 }
 0x309   : > { %v2966_v44 = vpop.eup %2965  ;;  %2704 = vmatprep.subr.msk.mxu1 %vm1415_vm0, %v2964_v43  ;;  %2695 = vmatpush1.msk.msra.mxu0 %vm1415_vm0, %v2960_v41 }
 0x30a   : > { %v2968_v45 = vpop.eup %2967  ;;  %2705 = vmatpush1.msk.msra.mxu1 %vm1415_vm0, %v2966_v44  ;;  %1726 = vmatprep.subr.mxu0 %v2958_v40 }
 0x30b   : > { %v2970_v46 = vpop.eup %2969  ;;  %1839 = vmatprep.subr.mxu1 %v2968_v45  ;;  %1727 = vmatpush1.msra.mxu0 %v2956_v39 }
 0x30c   : > { %v2972_v48 = vpop.eup %2971  ;;  %1840 = vmatpush1.msra.mxu1 %v2970_v46  ;;  %1728 = vmatprep.subr.mxu0 %v2954_v38 }
 0x30d   : > { %v2974_v49 = vpop.eup %2973  ;;  %1841 = vmatprep.subr.mxu1 %v2972_v48  ;;  %1729 = vmatpush1.msra.mxu0 %v2952_v37 }
 0x30e   : > { %1842 = vmatpush1.msra.mxu1 %v2974_v49  ;;  %2696 = vmatmul.mubr.msk.f32.vlgmr.msra.gmra.mxu0 %vm1405_vm1, %v1606_v47 }
 0x30f   : > { %2706 = vmatmul.mubr.msk.f32.vlgmr.msra.gmra.mxu1 %vm1405_vm1, %v1606_v47  ;;  %1768 = vmatprep.mubr.f32.mxu0 %v3296_v30 }
 0x310   : > { %1881 = vmatprep.mubr.f32.mxu1 %v3296_v30 }
 0x312   : > { %2697 = vmatmul.mubr.msk.f32.gmra.mxu0 %vm1405_vm1, %v1607_v50 }
 0x313   : > { %2707 = vmatmul.mubr.msk.f32.gmra.mxu1 %vm1405_vm1, %v1607_v50  ;;  %1774 = vmatprep.mubr.f32.mxu0 %v3296_v30 }
 0x314   : > { %1887 = vmatprep.mubr.f32.mxu1 %v3296_v30 }
 0x316   : > { %2698 = vmatmul.mubr.msk.f32.gmra.mxu0 %vm1405_vm1, %v1608_v51 }
 0x317   : > { %2708 = vmatmul.mubr.msk.f32.gmra.mxu1 %vm1405_vm1, %v1608_v51  ;;  %1780 = vmatprep.mubr.f32.mxu0 %v3296_v30 }
 0x318   : > { %1893 = vmatprep.mubr.f32.mxu1 %v3296_v30 }
 0x31a   : > { %2699 = vmatmul.mubr.msk.f32.gmra.mxu0 %vm1405_vm1, %v1609_v52 }
 0x31b   : > { %2709 = vmatmul.mubr.msk.f32.gmra.mxu1 %vm1405_vm1, %v1609_v52  ;;  %1786 = vmatprep.mubr.f32.mxu0 %v3296_v30 }
 0x31c   : > { %1899 = vmatprep.mubr.f32.mxu1 %v3296_v30 }
 0x31e   : > { %2700 = vmatmul.mubr.msk.f32.gmra.mxu0 %vm1405_vm1, %v1610_v53 }
 0x31f   : > { %2710 = vmatmul.mubr.msk.f32.gmra.mxu1 %vm1405_vm1, %v1610_v53  ;;  %1792 = vmatprep.mubr.f32.mxu0 %v3296_v30 }
 0x320   : > { %1905 = vmatprep.mubr.f32.mxu1 %v3296_v30 }
 0x322   : > { %2701 = vmatmul.mubr.msk.f32.gmra.mxu0 %vm1405_vm1, %v1611_v54 }
 0x323   : > { %2711 = vmatmul.mubr.msk.f32.gmra.mxu1 %vm1405_vm1, %v1611_v54  ;;  %1798 = vmatprep.mubr.f32.mxu0 %v3296_v30 }
 0x324   : > { %1911 = vmatprep.mubr.f32.mxu1 %v3296_v30 }
 0x326   : > { %2702 = vmatmul.mubr.msk.f32.gmra.mxu0 %vm1405_vm1, %v1612_v55 }
 0x327   : > { %2712 = vmatmul.mubr.msk.f32.gmra.mxu1 %vm1405_vm1, %v1612_v55  ;;  %1804 = vmatprep.mubr.f32.mxu0 %v3296_v30 }
 0x328   : > { %1917 = vmatprep.mubr.f32.mxu1 %v3296_v30 }
 0x32a   : > { %2703 = vmatmul.mubr.msk.f32.gmra.mxu0 %vm1405_vm1, %v1613_v56 }
 0x32b   : > { %2713 = vmatmul.mubr.msk.f32.gmra.mxu1 %vm1405_vm1, %v1613_v56  ;;  %2113 = vmatprep.mubr.f32.mxu0 %v3296_v30 }
 0x32c   : > { %2226 = vmatprep.mubr.f32.mxu1 %v3296_v30 }
 0x3ce   : > { %v1764_v59 = vpop.f32.mrf.mxu0 }
 0x3cf   : > { %v4601_v61 = vpop.f32.mrf.mxu1  ;;  %v1765_v14 = vadd.f32 %v1764_v59, %v4619_v12 }
 0x3d0   : > { %v1766_v62 = vpop.f32.mrf.mxu0 }
 0x3d1   : > { %v4605_v0 = vpop.f32.mrf.mxu1  ;;  %v1767_v17 = vadd.f32 %v1766_v62, %v4619_v12  ;;  %2975 = vtanh.f32 %v1765_v14 }
 0x3d2   : > { %v1770_v1 = vpop.f32.mrf.mxu0 }
 0x3d3   : > { %v4607_v2 = vpop.f32.mrf.mxu1  ;;  %v1771_v19 = vadd.f32 %v1770_v1, %v4624_v16  ;;  %2977 = vtanh.f32 %v1767_v17 }
 0x3d4   : > { %v1772_v3 = vpop.f32.mrf.mxu0 }
 0x3d5   : > { %v4611_v5 = vpop.f32.mrf.mxu1  ;;  %v1773_v21 = vadd.f32 %v1772_v3, %v4624_v16  ;;  %2979 = vtanh.f32 %v1771_v19 }
 0x3d6   : > { %v1776_v6 = vpop.f32.mrf.mxu0 }
 0x3d7   : > { %v4615_v8 = vpop.f32.mrf.mxu1  ;;  %v1777_v23 = vadd.f32 %v1776_v6, %v4609_v4  ;;  %2981 = vtanh.f32 %v1773_v21 }
 0x3d8   : > { %v1778_v9 = vpop.f32.mrf.mxu0 }
 0x3d9   : > { %v4617_v10 = vpop.f32.mrf.mxu1  ;;  %v1779_v25 = vadd.f32 %v1778_v9, %v4609_v4  ;;  %2983 = vtanh.f32 %v1777_v23 }
 0x3da   : > { %v1782_v11 = vpop.f32.mrf.mxu0  ;;  %v1892_v19 = vadd.f32 %v4617_v10, %v4609_v4  ;;  %v1880_v10 = vadd.f32 %v4605_v0, %v4619_v12 }
 0x3db   : > { %v4621_v13 = vpop.f32.mrf.mxu1  ;;  %v1783_v27 = vadd.f32 %v1782_v11, %v4613_v7  ;;  %2985 = vtanh.f32 %v1779_v25 }
 0x3dc   : > { %v1784_v15 = vpop.f32.mrf.mxu0  ;;  %v1896_v17 = vadd.f32 %v4621_v13, %v4613_v7 }
 0x3dd   : > { %v4627_v18 = vpop.f32.mrf.mxu1  ;;  %v1785_v29 = vadd.f32 %v1784_v15, %v4613_v7  ;;  %2987 = vtanh.f32 %v1783_v27 }
 0x3de   : > { %v1788_v20 = vpop.f32.mrf.mxu0  ;;  %v4642_v48 = vpop.eup %2975  ;;  %v1898_v14 = vadd.f32 %v4627_v18, %v4613_v7  ;;  %v1886_v18 = vadd.f32 %v4611_v5, %v4624_v16  ;;  %v1884_v7 = vadd.f32 %v4607_v2, %v4624_v16 }
 0x3df   : > { %v1901_v22 = vpop.f32.mrf.mxu1  ;;  %v1789_v32 = vadd.f32 %v1788_v20, %v4599_v60  ;;  %2989 = vtanh.f32 %v1785_v29 }
 0x3e0   : > { %v1790_v24 = vpop.f32.mrf.mxu0  ;;  %v4646_v52 = vpop.eup %2977  ;;  %v1902_v11 = vadd.f32 %v1901_v22, %v4599_v60 }
 0x3e1   : > { %v1903_v26 = vpop.f32.mrf.mxu1  ;;  %v1791_v34 = vadd.f32 %v1790_v24, %v4599_v60  ;;  %2991 = vtanh.f32 %v1789_v32 }
 0x3e2   : > { %v1794_v28 = vpop.f32.mrf.mxu0  ;;  %v4650_v55 = vpop.eup %2979  ;;  %v1904_v9 = vadd.f32 %v1903_v26, %v4599_v60  ;;  %v1890_v60 = vadd.f32 %v4615_v8, %v4609_v4  ;;  %v1878_v4 = vadd.f32 %v4601_v61, %v4619_v12 }
 0x3e3   : > { %v1907_v31 = vpop.f32.mrf.mxu1  ;;  %v1795_v36 = vadd.f32 %v1794_v28, %v4603_v63  ;;  %2993 = vtanh.f32 %v1791_v34 }
 0x3e4   : > { %v1796_v33 = vpop.f32.mrf.mxu0  ;;  %v4653_v59 = vpop.eup %2981  ;;  %v1908_v3 = vadd.f32 %v1907_v31, %v4603_v63 }
 0x3e5   : > { %v1909_v35 = vpop.f32.mrf.mxu1  ;;  %v1797_v38 = vadd.f32 %v1796_v33, %v4603_v63  ;;  %2995 = vtanh.f32 %v1795_v36  ;;  %v1956_v33 = vld [vmem:[%s4901_s7] sm:$0xff]  ;;  %v1957_v36 = vld [vmem:[%s4901_s7 + $0x8] sm:$0xff] }
 0x3e6   : > { %v1800_v37 = vpop.f32.mrf.mxu0  ;;  %v1910_v62 = vadd.f32 %v1909_v35, %v4603_v63  ;;  %v4656_v1 = vpop.eup %2983 }
 0x3e7   : > { %v1913_v39 = vpop.f32.mrf.mxu1  ;;  %v1801_v40 = vadd.f32 %v1800_v37, %v4595_v57  ;;  %2997 = vtanh.f32 %v1797_v38  ;;  %v1958_v37 = vld [vmem:[%s4901_s7 + $0x10] sm:$0xff]  ;;  %v1959_v38 = vld [vmem:[%s4901_s7 + $0x18] sm:$0xff] }
 0x3e8   : > { %v1802_v41 = vpop.f32.mrf.mxu0  ;;  %v1914_v56 = vadd.f32 %v1913_v39, %v4595_v57  ;;  %v4659_v6 = vpop.eup %2985  ;;  %v1960_v39 = vld [vmem:[%s4901_s7 + $0x20] sm:$0xff] }
 0x3e9   : > { %v1803_v42 = vadd.f32 %v1802_v41, %v4595_v57  ;;  %v1915_v43 = vpop.f32.mrf.mxu1  ;;  %2999 = vtanh.f32 %v1801_v40  ;;  %v1961_v40 = vld [vmem:[%s4901_s7 + $0x28] sm:$0xff]  ;;  %v1962_v41 = vld [vmem:[%s4901_s7 + $0x30] sm:$0xff] }
 0x3ea   : > { %v1806_v44 = vpop.f32.mrf.mxu0  ;;  %v1916_v53 = vadd.f32 %v1915_v43, %v4595_v57  ;;  %v4745_v43 = vpop.permute.xlu1 %2004 }
 0x3eb   : > { %v1807_v45 = vadd.f32 %v1806_v44, %v4597_v58  ;;  %v1919_v46 = vpop.f32.mrf.mxu1  ;;  %3001 = vtanh.f32 %v1803_v42  ;;  %v1963_v42 = vld [vmem:[%s4901_s7 + $0x38] sm:$0xf]  ;;  %v4747_v44 = vpop.permute.xlu0 %2009 }
 0x3ec   : > { %v1808_v47 = vpop.f32.mrf.mxu0  ;;  %v1920_v49 = vadd.f32 %v1919_v46, %v4597_v58 }
 0x3ed   : > { %v1809_v50 = vadd.f32 %v1808_v47, %v4597_v58  ;;  %v1921_v51 = vpop.f32.mrf.mxu1  ;;  %3003 = vtanh.f32 %v1807_v45 }
 0x3ee   : > { %v1922_v54 = vadd.f32 %v1921_v51, %v4597_v58  ;;  %v2988_v58 = vpop.eup %2987  ;;  %v4749_v46 = vpop.permute.xlu1 %1994 }
 0x3ef   : > { %3005 = vtanh.f32 %v1809_v50  ;;  %v2990_v57 = vpop.eup %2989 }
 0x3f0   : > { %3007 = vtanh.f32 %v1922_v54  ;;  %v2992_v15 = vpop.eup %2991 }
 0x3f1   : > { %3009 = vtanh.f32 %v1920_v49  ;;  %v2994_v63 = vpop.eup %2993  ;;  %v4753_v49 = vpop.permute.xlu0 %1999 }
 0x3f2   : > { %3011 = vtanh.f32 %v1916_v53  ;;  %v2996_v20 = vpop.eup %2995  ;;  %v4759_v54 = vpop.permute.xlu1 %1984 }
 0x3f3   : > { %3013 = vtanh.f32 %v1914_v56 }
 0x3f4   : > { %3015 = vtanh.f32 %v1910_v62  ;;  %v2998_v21 = vpop.eup %2997 }
 0x3f5   : > { %3017 = vtanh.f32 %v1908_v3  ;;  %v4763_v56 = vpop.permute.xlu0 %1989 }
 0x3f6   : > { %3019 = vtanh.f32 %v1904_v9  ;;  %v3000_v22 = vpop.eup %2999 }
 0x3f7   : > { %3021 = vtanh.f32 %v1902_v11 }
 0x3f8   : > { %3023 = vtanh.f32 %v1898_v14  ;;  %v3002_v13 = vpop.eup %3001 }
 0x3f9   : > { %3025 = vtanh.f32 %v1896_v17 }
 0x3fa   : > { %3027 = vtanh.f32 %v1892_v19  ;;  %v3004_v23 = vpop.eup %3003 }
 0x3fb   : > { %3029 = vtanh.f32 %v1890_v60 }
 0x3fc   : > { %v3006_v8 = vpop.eup %3005  ;;  %3031 = vtanh.f32 %v1886_v18 }
 0x3fd   : > { %v3008_v24 = vpop.eup %3007  ;;  %3033 = vtanh.f32 %v1884_v7  ;;  %2714 = vmatprep.subr.msk.mxu0 %vm1415_vm0, %v3006_v8 }
 0x3fe   : > { %v3010_v5 = vpop.eup %3009  ;;  %3035 = vtanh.f32 %v1880_v10  ;;  %2724 = vmatprep.subr.msk.mxu1 %vm1415_vm0, %v3008_v24  ;;  %2715 = vmatpush1.msk.msra.mxu0 %vm1415_vm0, %v3004_v23 }
 0x3ff   : > { %v3012_v2 = vpop.eup %3011  ;;  %3037 = vtanh.f32 %v1878_v4  ;;  %2725 = vmatpush1.msk.msra.mxu1 %vm1415_vm0, %v3010_v5  ;;  %2067 = vmatprep.subr.mxu0 %v3002_v13 }
 0x400   : > { %v3014_v0 = vpop.eup %3013  ;;  %2180 = vmatprep.subr.mxu1 %v3012_v2  ;;  %2068 = vmatpush1.msra.mxu0 %v3000_v22 }
 0x401   : > { %v3016_v61 = vpop.eup %3015  ;;  %2181 = vmatpush1.msra.mxu1 %v3014_v0  ;;  %2069 = vmatprep.subr.mxu0 %v2998_v21 }
 0x402   : > { %v3018_v12 = vpop.eup %3017  ;;  %2182 = vmatprep.subr.mxu1 %v3016_v61  ;;  %2070 = vmatpush1.msra.mxu0 %v2996_v20 }
 0x403   : > { %v3020_v16 = vpop.eup %3019  ;;  %2183 = vmatpush1.msra.mxu1 %v3018_v12  ;;  %2071 = vmatprep.subr.mxu0 %v2994_v63 }
 0x404   : > { %v3022_v25 = vpop.eup %3021  ;;  %2184 = vmatprep.subr.mxu1 %v3020_v16  ;;  %2072 = vmatpush1.msra.mxu0 %v2992_v15 }
 0x405   : > { %v3024_v26 = vpop.eup %3023  ;;  %2185 = vmatpush1.msra.mxu1 %v3022_v25  ;;  %2073 = vmatprep.subr.mxu0 %v2990_v57  ;;  %v4774_v57 = vpop.permute.xlu0 %1979 }
 0x406   : > { %v3026_v27 = vpop.eup %3025  ;;  %2186 = vmatprep.subr.mxu1 %v3024_v26  ;;  %2074 = vmatpush1.msra.mxu0 %v2988_v58 }
 0x407   : > { %v3028_v28 = vpop.eup %3027  ;;  %2187 = vmatpush1.msra.mxu1 %v3026_v27  ;;  %2075 = vmatprep.subr.mxu0 %v4659_v6  ;;  %v4769_v6 = vpop.permute.xlu1 %1974 }
 0x408   : > { %v3030_v29 = vpop.eup %3029  ;;  %2188 = vmatprep.subr.mxu1 %v3028_v28  ;;  %2076 = vmatpush1.msra.mxu0 %v4656_v1 }
 0x409   : > { %v3032_v31 = vpop.eup %3031  ;;  %2189 = vmatpush1.msra.mxu1 %v3030_v29  ;;  %2077 = vmatprep.subr.mxu0 %v4653_v59 }
 0x40a   : > { %v3034_v32 = vpop.eup %3033  ;;  %2190 = vmatprep.subr.mxu1 %v3032_v31  ;;  %2078 = vmatpush1.msra.mxu0 %v4650_v55 }
 0x40b   : > { %v3036_v34 = vpop.eup %3035  ;;  %2191 = vmatpush1.msra.mxu1 %v3034_v32  ;;  %2079 = vmatprep.subr.mxu0 %v4646_v52 }
 0x40c   : > { %v3038_v35 = vpop.eup %3037  ;;  %2192 = vmatprep.subr.mxu1 %v3036_v34  ;;  %2080 = vmatpush1.msra.mxu0 %v4642_v48 }
 0x40d   : > { %2193 = vmatpush1.msra.mxu1 %v3038_v35  ;;  %2716 = vmatmul.mubr.msk.f32.vlgmr.msra.gmra.mxu0 %vm2012_vm2, %v1956_v33 }
 0x40e   : > { %2726 = vmatmul.mubr.msk.f32.vlgmr.msra.gmra.mxu1 %vm2012_vm2, %v1956_v33  ;;  %2119 = vmatprep.mubr.f32.mxu0 %v3296_v30 }
 0x40f   : > { %2232 = vmatprep.mubr.f32.mxu1 %v3296_v30 }
 0x411   : > { %2717 = vmatmul.mubr.msk.f32.gmra.mxu0 %vm2012_vm2, %v1957_v36 }
 0x412   : > { %2727 = vmatmul.mubr.msk.f32.gmra.mxu1 %vm2012_vm2, %v1957_v36  ;;  %2125 = vmatprep.mubr.f32.mxu0 %v3296_v30 }
 0x413   : > { %2238 = vmatprep.mubr.f32.mxu1 %v3296_v30 }
 0x415   : > { %2718 = vmatmul.mubr.msk.f32.gmra.mxu0 %vm2012_vm2, %v1958_v37 }
 0x416   : > { %2728 = vmatmul.mubr.msk.f32.gmra.mxu1 %vm2012_vm2, %v1958_v37  ;;  %2131 = vmatprep.mubr.f32.mxu0 %v3296_v30 }
 0x417   : > { %2244 = vmatprep.mubr.f32.mxu1 %v3296_v30 }
 0x419   : > { %2719 = vmatmul.mubr.msk.f32.gmra.mxu0 %vm2012_vm2, %v1959_v38 }
 0x41a   : > { %2729 = vmatmul.mubr.msk.f32.gmra.mxu1 %vm2012_vm2, %v1959_v38  ;;  %2137 = vmatprep.mubr.f32.mxu0 %v3296_v30 }
 0x41b   : > { %2250 = vmatprep.mubr.f32.mxu1 %v3296_v30 }
 0x41d   : > { %2720 = vmatmul.mubr.msk.f32.gmra.mxu0 %vm2012_vm2, %v1960_v39 }
 0x41e   : > { %2730 = vmatmul.mubr.msk.f32.gmra.mxu1 %vm2012_vm2, %v1960_v39  ;;  %2143 = vmatprep.mubr.f32.mxu0 %v3296_v30 }
 0x41f   : > { %2256 = vmatprep.mubr.f32.mxu1 %v3296_v30 }
 0x421   : > { %2721 = vmatmul.mubr.msk.f32.gmra.mxu0 %vm2012_vm2, %v1961_v40 }
 0x422   : > { %2731 = vmatmul.mubr.msk.f32.gmra.mxu1 %vm2012_vm2, %v1961_v40  ;;  %2149 = vmatprep.mubr.f32.mxu0 %v3296_v30 }
 0x423   : > { %2262 = vmatprep.mubr.f32.mxu1 %v3296_v30 }
 0x425   : > { %2722 = vmatmul.mubr.msk.f32.gmra.mxu0 %vm2012_vm2, %v1962_v41 }
 0x426   : > { %2732 = vmatmul.mubr.msk.f32.gmra.mxu1 %vm2012_vm2, %v1962_v41  ;;  %2155 = vmatprep.mubr.f32.mxu0 %v3296_v30 }
 0x427   : > { %2268 = vmatprep.mubr.f32.mxu1 %v3296_v30 }
 0x429   : > { %2723 = vmatmul.mubr.msk.f32.gmra.mxu0 %vm2012_vm2, %v1963_v42 }
 0x42a   : > { %2733 = vmatmul.mubr.msk.f32.gmra.mxu1 %vm2012_vm2, %v1963_v42  ;;  %2393 = vmatprep.mubr.f32.mxu0 %v3296_v30 }
 0x42b   : > { %2464 = vmatprep.mubr.f32.mxu1 %v3296_v30 }
 0x4cd   : > { %v2115_v45 = vpop.f32.mrf.mxu0 }
 0x4ce   : > { %v4751_v47 = vpop.f32.mrf.mxu1  ;;  %v2116_v58 = vadd.f32 %v2115_v45, %v4769_v6 }
 0x4cf   : > { %v2117_v48 = vpop.f32.mrf.mxu0 }
 0x4d0   : > { %v4755_v50 = vpop.f32.mrf.mxu1  ;;  %v2118_v14 = vadd.f32 %v2117_v48, %v4769_v6  ;;  %3039 = vtanh.f32 %v2116_v58 }
 0x4d1   : > { %v2121_v51 = vpop.f32.mrf.mxu0 }
 0x4d2   : > { %v4757_v52 = vpop.f32.mrf.mxu1  ;;  %v2122_v17 = vadd.f32 %v2121_v51, %v4774_v57  ;;  %3041 = vtanh.f32 %v2118_v14 }
 0x4d3   : > { %v2123_v53 = vpop.f32.mrf.mxu0 }
 0x4d4   : > { %v4761_v30 = vpop.f32.mrf.mxu1  ;;  %v2124_v19 = vadd.f32 %v2123_v53, %v4774_v57  ;;  %3043 = vtanh.f32 %v2122_v17 }
 0x4d5   : > { %v2127_v55 = vpop.f32.mrf.mxu0 }
 0x4d6   : > { %v4765_v59 = vpop.f32.mrf.mxu1  ;;  %v2128_v60 = vadd.f32 %v2127_v55, %v4759_v54  ;;  %3045 = vtanh.f32 %v2124_v19 }
 0x4d7   : > { %v2129_v62 = vpop.f32.mrf.mxu0 }
 0x4d8   : > { %v4767_v1 = vpop.f32.mrf.mxu1  ;;  %v2130_v18 = vadd.f32 %v2129_v62, %v4759_v54  ;;  %3047 = vtanh.f32 %v2128_v60 }
 0x4d9   : > { %v2133_v3 = vpop.f32.mrf.mxu0  ;;  %v2243_v14 = vadd.f32 %v4767_v1, %v4759_v54  ;;  %v2231_v1 = vadd.f32 %v4755_v50, %v4769_v6 }
 0x4da   : > { %v4771_v9 = vpop.f32.mrf.mxu1  ;;  %v2134_v7 = vadd.f32 %v2133_v3, %v4763_v56  ;;  %3049 = vtanh.f32 %v2130_v18 }
 0x4db   : > { %v2135_v11 = vpop.f32.mrf.mxu0 }
 0x4dc   : > { %v4777_v15 = vpop.f32.mrf.mxu1  ;;  %v2136_v10 = vadd.f32 %v2135_v11, %v4763_v56  ;;  %3051 = vtanh.f32 %v2134_v7  ;;  %v2247_v11 = vadd.f32 %v4771_v9, %v4763_v56 }
 0x4dd   : > { %v2139_v63 = vpop.f32.mrf.mxu0  ;;  %v4792_v33 = vpop.eup %3039  ;;  %v2249_v3 = vadd.f32 %v4777_v15, %v4763_v56  ;;  %v2237_v15 = vadd.f32 %v4761_v30, %v4774_v57  ;;  %v2235_v56 = vadd.f32 %v4757_v52, %v4774_v57 }
 0x4de   : > { %v2252_v20 = vpop.f32.mrf.mxu1  ;;  %v2140_v4 = vadd.f32 %v2139_v63, %v4749_v46  ;;  %3053 = vtanh.f32 %v2136_v10 }
 0x4df   : > { %v2141_v21 = vpop.f32.mrf.mxu0  ;;  %v4796_v37 = vpop.eup %3041  ;;  %v2253_v62 = vadd.f32 %v2252_v20, %v4749_v46 }
 0x4e0   : > { %v2254_v22 = vpop.f32.mrf.mxu1  ;;  %v2142_v24 = vadd.f32 %v2141_v21, %v4749_v46  ;;  %3055 = vtanh.f32 %v2140_v4  ;;  %v2307_v4 = vld [vmem:[%s4903_s9] sm:$0x7] }
 0x4e1   : > { %v2145_v13 = vpop.f32.mrf.mxu0  ;;  %v4800_v40 = vpop.eup %3043  ;;  %v2255_v55 = vadd.f32 %v2254_v22, %v4749_v46  ;;  %v2241_v46 = vadd.f32 %v4765_v59, %v4759_v54  ;;  %v2229_v54 = vadd.f32 %v4751_v47, %v4769_v6 }
 0x4e2   : > { %v2258_v23 = vpop.f32.mrf.mxu1  ;;  %v2146_v2 = vadd.f32 %v2145_v13, %v4753_v49  ;;  %3057 = vtanh.f32 %v2142_v24 }
 0x4e3   : > { %v2147_v8 = vpop.f32.mrf.mxu0  ;;  %v4803_v42 = vpop.eup %3045  ;;  %v2259_v51 = vadd.f32 %v2258_v23, %v4753_v49 }
 0x4e4   : > { %v2260_v5 = vpop.f32.mrf.mxu1  ;;  %v2148_v61 = vadd.f32 %v2147_v8, %v4753_v49  ;;  %3059 = vtanh.f32 %v2146_v2 }
 0x4e5   : > { %v2151_v0 = vpop.f32.mrf.mxu0  ;;  %v2261_v45 = vadd.f32 %v2260_v5, %v4753_v49  ;;  %v4806_v48 = vpop.eup %3047 }
 0x4e6   : > { %v2264_v12 = vpop.f32.mrf.mxu1  ;;  %v2152_v16 = vadd.f32 %v2151_v0, %v4745_v43  ;;  %3061 = vtanh.f32 %v2148_v61  ;;  %v2312_v0 = vpop.permute.xlu0 %2311 }
 0x4e7   : > { %v2153_v25 = vpop.f32.mrf.mxu0  ;;  %v2265_v41 = vadd.f32 %v2264_v12, %v4745_v43  ;;  %v4809_v53 = vpop.eup %3049 }
 0x4e8   : > { %v2154_v26 = vadd.f32 %v2153_v25, %v4745_v43  ;;  %v2266_v27 = vpop.f32.mrf.mxu1  ;;  %3063 = vtanh.f32 %v2152_v16 }
 0x4e9   : > { %v2157_v28 = vpop.f32.mrf.mxu0  ;;  %v2267_v38 = vadd.f32 %v2266_v27, %v4745_v43 }
 0x4ea   : > { %v2158_v29 = vadd.f32 %v2157_v28, %v4747_v44  ;;  %v2270_v31 = vpop.f32.mrf.mxu1  ;;  %3065 = vtanh.f32 %v2154_v26 }
 0x4eb   : > { %v2159_v32 = vpop.f32.mrf.mxu0  ;;  %v2271_v34 = vadd.f32 %v2270_v31, %v4747_v44 }
 0x4ec   : > { %v2160_v35 = vadd.f32 %v2159_v32, %v4747_v44  ;;  %v2272_v36 = vpop.f32.mrf.mxu1  ;;  %3067 = vtanh.f32 %v2158_v29 }
 0x4ed   : > { %v2273_v39 = vadd.f32 %v2272_v36, %v4747_v44  ;;  %v3052_v44 = vpop.eup %3051 }
 0x4ee   : > { %3069 = vtanh.f32 %v2160_v35  ;;  %v3054_v43 = vpop.eup %3053 }
 0x4ef   : > { %3071 = vtanh.f32 %v2273_v39  ;;  %v3056_v58 = vpop.eup %3055 }
 0x4f0   : > { %3073 = vtanh.f32 %v2271_v34  ;;  %v3058_v49 = vpop.eup %3057 }
 0x4f1   : > { %3075 = vtanh.f32 %v2267_v38  ;;  %v3060_v17 = vpop.eup %3059 }
 0x4f2   : > { %3077 = vtanh.f32 %v2265_v41 }
 0x4f3   : > { %3079 = vtanh.f32 %v2261_v45  ;;  %v3062_v63 = vpop.eup %3061 }
 0x4f4   : > { %3081 = vtanh.f32 %v2259_v51 }
 0x4f5   : > { %3083 = vtanh.f32 %v2255_v55  ;;  %v3064_v19 = vpop.eup %3063 }
 0x4f6   : > { %3085 = vtanh.f32 %v2253_v62 }
 0x4f7   : > { %3087 = vtanh.f32 %v2249_v3  ;;  %v3066_v9 = vpop.eup %3065 }
 0x4f8   : > { %3089 = vtanh.f32 %v2247_v11 }
 0x4f9   : > { %3091 = vtanh.f32 %v2243_v14  ;;  %v3068_v20 = vpop.eup %3067 }
 0x4fa   : > { %3093 = vtanh.f32 %v2241_v46 }
 0x4fb   : > { %v3070_v59 = vpop.eup %3069  ;;  %3095 = vtanh.f32 %v2237_v15 }
 0x4fc   : > { %v3072_v60 = vpop.eup %3071  ;;  %3097 = vtanh.f32 %v2235_v56  ;;  %2734 = vmatprep.subr.msk.mxu0 %vm1415_vm0, %v3070_v59 }
 0x4fd   : > { %v3074_v30 = vpop.eup %3073  ;;  %3099 = vtanh.f32 %v2231_v1  ;;  %2737 = vmatprep.subr.msk.mxu1 %vm1415_vm0, %v3072_v60  ;;  %2735 = vmatpush1.msk.msra.mxu0 %vm1415_vm0, %v3068_v20 }
 0x4fe   : > { %v3076_v52 = vpop.eup %3075  ;;  %3101 = vtanh.f32 %v2229_v54  ;;  %2738 = vmatpush1.msk.msra.mxu1 %vm1415_vm0, %v3074_v30  ;;  %2347 = vmatprep.subr.mxu0 %v3066_v9 }
 0x4ff   : > { %v3078_v50 = vpop.eup %3077  ;;  %2418 = vmatprep.subr.mxu1 %v3076_v52  ;;  %2348 = vmatpush1.msra.mxu0 %v3064_v19 }
 0x500   : > { %v3080_v47 = vpop.eup %3079  ;;  %2419 = vmatpush1.msra.mxu1 %v3078_v50  ;;  %2349 = vmatprep.subr.mxu0 %v3062_v63 }
 0x501   : > { %v3082_v6 = vpop.eup %3081  ;;  %2420 = vmatprep.subr.mxu1 %v3080_v47  ;;  %2350 = vmatpush1.msra.mxu0 %v3060_v17 }
 0x502   : > { %v3084_v57 = vpop.eup %3083  ;;  %2421 = vmatpush1.msra.mxu1 %v3082_v6  ;;  %2351 = vmatprep.subr.mxu0 %v3058_v49 }
 0x503   : > { %v3086_v21 = vpop.eup %3085  ;;  %2422 = vmatprep.subr.mxu1 %v3084_v57  ;;  %2352 = vmatpush1.msra.mxu0 %v3056_v58 }
 0x504   : > { %v3088_v18 = vpop.eup %3087  ;;  %2423 = vmatpush1.msra.mxu1 %v3086_v21  ;;  %2353 = vmatprep.subr.mxu0 %v3054_v43 }
 0x505   : > { %v3090_v22 = vpop.eup %3089  ;;  %2424 = vmatprep.subr.mxu1 %v3088_v18  ;;  %2354 = vmatpush1.msra.mxu0 %v3052_v44 }
 0x506   : > { %v3092_v7 = vpop.eup %3091  ;;  %2425 = vmatpush1.msra.mxu1 %v3090_v22  ;;  %2355 = vmatprep.subr.mxu0 %v4809_v53 }
 0x507   : > { %v3094_v13 = vpop.eup %3093  ;;  %2426 = vmatprep.subr.mxu1 %v3092_v7  ;;  %2356 = vmatpush1.msra.mxu0 %v4806_v48 }
 0x508   : > { %v3096_v10 = vpop.eup %3095  ;;  %2427 = vmatpush1.msra.mxu1 %v3094_v13  ;;  %2357 = vmatprep.subr.mxu0 %v4803_v42 }
 0x509   : > { %v3098_v23 = vpop.eup %3097  ;;  %2428 = vmatprep.subr.mxu1 %v3096_v10  ;;  %2358 = vmatpush1.msra.mxu0 %v4800_v40 }
 0x50a   : > { %v3100_v8 = vpop.eup %3099  ;;  %2429 = vmatpush1.msra.mxu1 %v3098_v23  ;;  %2359 = vmatprep.subr.mxu0 %v4796_v37 }
 0x50b   : > { %v3102_v24 = vpop.eup %3101  ;;  %2430 = vmatprep.subr.mxu1 %v3100_v8  ;;  %2360 = vmatpush1.msra.mxu0 %v4792_v33 }
 0x50c   : > { %2431 = vmatpush1.msra.mxu1 %v3102_v24  ;;  %2736 = vmatmul.mubr.msk.f32.vlgmr.msra.gmra.mxu0 %vm2012_vm2, %v2307_v4 }
 0x50d   : > { %2739 = vmatmul.mubr.msk.f32.vlgmr.msra.gmra.mxu1 %vm2012_vm2, %v2307_v4 }
 0x5cc   : > { %v2395_v5 = vpop.f32.mrf.mxu0 }
 0x5cd   : > { %v2466_v2 = vpop.f32.mrf.mxu1  ;;  %v2396_v12 = vadd.f32 %v2395_v5, %v2312_v0 }
 0x5ce   : > { %v2397_v61 = vpop.f32.mrf.mxu0  ;;  %v2467_v26 = vadd.f32 %v2466_v2, %v2312_v0 }
 0x5cf   : > { %v2398_v16 = vadd.f32 %v2397_v61, %v2312_v0  ;;  %v2468_v25 = vpop.f32.mrf.mxu1 }
 0x5d0   : > { %v2469_v27 = vadd.f32 %v2468_v25, %v2312_v0  ;;  %2488 = sbr.rel (!%p3397_p6) target bundleno = 1520 (0x5f0), region = 134 }
 0x5d1   : > { %v2475_v28 = vcombine.low %v2396_v12, %v2398_v16 }
 0x5d2   : > { %v2476_v29 = vcombine.low %v2467_v26, %v2469_v27 }
 0x5d3   : > { %2479 = vst [vmem:[%s1043_s12] sm:$0x77] %v2475_v28 }
 0x5d4   : > { %2480 = vst [vmem:[%s1043_s12 + $0x8] sm:$0x77] %v2476_v29 }
 0x5d5   : > { %s4970_s29 = smov (!%p2491_p7, %s2490_s29), 4 }
 0x5d6   : > { %s4849_s19 = sshll.u32 %s4970_s29, 6 }
 0x5d7   : > { %s2495_s28 = ssub.s32 256, %s4849_s19 }
 0x5d8   : > { %2496 = vsyncadd %s2482_s17, %s2495_s28  ;;  %p2743_p10 = scmp.ne.s32.totalorder %s4849_s19, 0  ;;  %s2754_s24 = sshll.u32 %s4950_s30, 8 }
 0x5d9   : > { %s4951_s13 = sld [smem:[#allocation14_spill]]  ;;  %s2502_s23 = sshll.u32 %s1043_s12, 4  ;;  %s2503_s23 = int_to_ptr.vmem [resolvable:$true] %s2502_s23 }
 0x5da   : > { %s3103_s0 = scalar_lea.vmem %s2503_s23, %s4849_s19  ;;  %s3297_s21 = smov [#allocation3]  }
 0x5db   : > { %p3104_p6 = scmp.ne.s32.totalorder %s2503_s23, %s3103_s0  ;;  %s3107_s15 = sshll.u32 %s3297_s21, 4  ;;  %s3108_s15 = int_to_ptr.vmem [resolvable:$false] %s3107_s15 }
 0x5dc   : > { %s3109_s16 = scalar_lea.vmem %s3108_s15, 512  ;;  %p3110_p13 = scmp.lt.s32.totalorder %s2503_s23, %s3108_s15 }
 0x5dd   : > { %p3105_p11 = pnand %p3104_p6, %p2743_p10  ;;  %p3111_p0 = scmp.lt.s32.totalorder %s3109_s16, %s3103_s0 }
 0x5df   : > { %s2499_s11 = scalar_lea.hbm %s4951_s13, %s2754_s24  ;;  %p3106_p12 = pneg %p3105_p11 }
 0x5e0   : > { %p3112_p1 = por %p3111_p0, %p3110_p13 }
 0x5e2   : > { %p3113_p2 = pnand %p3112_p1, %p3106_p12 }
 0x5e4   : > { %3116 = shalt.err (!%p3113_p2)
}
 0x5e5   : > { %s3117_s14 = scalar_lea.hbm %s2499_s11, %s4849_s19  ;;  %s3121_s27 = scalar_lea.hbm %s4951_s13, 448 }
 0x5e6   : > { %p3118_p3 = scmp.ne.s32.totalorder %s2499_s11, %s3117_s14  ;;  %p3122_p7 = scmp.lt.s32.totalorder %s2499_s11, %s4951_s13 }
 0x5e7   : > { %p3123_p6 = scmp.lt.s32.totalorder %s3121_s27, %s3117_s14 }
 0x5e8   : > { %p3119_p4 = pnand %p3118_p3, %p2743_p10 }
 0x5e9   : > { %p3124_p11 = por %p3123_p6, %p3122_p7 }
 0x5ea   : > { %p3120_p5 = pneg %p3119_p4 }
 0x5ec   : > { %p3125_p13 = pnand %p3124_p11, %p3120_p5 }
 0x5ee   : > { %3128 = shalt.err (!%p3125_p13)
}
 0x5ef   : > { %2505 = dma.vmem_to_hbm [thread:$0]  (%p2743_p10), %s2503_s23, %s4849_s19, %s2499_s11, %s2482_s17  }
 0x5f0 PF: > { %s4952_s24 = sld [smem:[#allocation6_spill]]  ;;  %p2757_p12 = pnand %p2651_p9, %p3401_p8 }
 0x5f2   : > { %p2758_p0 = pneg %p2757_p12 }
 0x5f6   : > { %s2514_s26 = sand.u32 1, %s4952_s24  }
 0x5f7   : > { %s2515_s0 = scalar_lea.sflag [#allocation4], %s2514_s26 }
 0x5f8   : > { %3210 = dma.done.wait (%p2758_p0), %s2515_s0, 256  }
 0x5f9   : > { %3212 = vsyncadd (%p2758_p0), %s2515_s0, 4294967040  ;;  %s4954_s20 = sld [smem:[#allocation9_spill]]  ;;  %s4957_s17 = smov %s3219_s18 }
 0x5fa   : > { %s4955_s21 = sld [smem:[#allocation7_spill]] }
 0x5fb   : > { %s4956_s19 = sld [smem:[#allocation10_spill]] }
 0x5ff   : > { %p21_p1 = scmp.ge.s32.totalorder %s4954_s20, 4  }
 0x600   : > { %s4958_s18 = smov %s4955_s21 }
 0x601   :  { %23 = sbr.rel (!%p21_p1) target bundleno = 6 (0x6), region = 232 }
 0x606   :  { %2520 = vsyncpa [#allocation4], 1 }
 0x607   :  { %2522 = vsyncpa [#allocation4 + $0x1], 1 }

</bundles_post_ra>
